<compile_context>
chip_gen: v7x
topology: tpu7x:2x2x1
jax: 0.10.0
libtpu: 0.0.40
codegen_flags: <defaults>
</compile_context>

<pallas_src>
import numpy as np

import jax
import jax.numpy as jnp
from jax import lax
from jax.experimental import pallas as pl
from jax.experimental.pallas import tpu as pltpu  # noqa: F401  (TPU backend)

D_LONG = 768   # dlstm input width
D_SHORT = 8    # clstm input width
D_IN = D_LONG + D_SHORT


# ----------------------------------------------------------------------------
# Pallas kernel: the entire GSpadeNodeEmbeddingBeta forward on resident VMEM.
# ----------------------------------------------------------------------------
def _node_embedding_kernel(seq_ref, mask_ref, wih_ref, b_ref, whh_ref,
                           fm_ref, bm_ref, x_ref, tf_ref,
                           wx_ref, wseq_ref, wtf_ref, bout_ref, o_ref):
    """Fused-chain layout (chain order: 0=long-fwd, 1=short-fwd, 2=long-bwd, 3=short-bwd):

      hidden/cell/acc : (B, 4H)          = [h_lf | h_sf | h_lb | h_sb]
      gates           : (B, 16H) = 256   = [ i(4H) | f(4H) | g(4H) | o(4H) ], chains inside
      whh             : (4H, 16H) block-diagonal, sigmoid-gate columns pre-scaled by 0.5
      w_ih            : (776, 16H)       [long 768 rows | short 8 rows] -> same gate layout
    """
    B = x_ref.shape[0]
    T = seq_ref.shape[0] // B
    G = whh_ref.shape[0]                 # 4*H fused hidden width (= 64 for d_hidden=32)

    whh = whh_ref[...]

    # Hoisted, lane-dense input projection for all 4 chains at once.
    proj = (jnp.dot(seq_ref[...], wih_ref[...], preferred_element_type=jnp.float32)
            + b_ref[...])
    # TODO(synk): default MXU precision here (bf16 passes); use precision=HIGHEST if exact
    # f32 parity with the PyTorch module is required.

    # Split forward-chain / backward-chain gate lanes ONCE (hoisted out of the loop);
    # backward chains consume their projection rows in reversed time order.
    pf = proj * fm_ref[...]
    pb = proj * bm_ref[...]
    masks = mask_ref[...]                # (T*B, 4H) per-chain validity, host-precomputed

    h = jnp.zeros((B, G), jnp.float32)
    c = jnp.zeros((B, G), jnp.float32)
    acc = jnp.zeros((B, G), jnp.float32)

    # Static, fully unrolled time loop: one MXU push + two tanh per step cover all four
    # direction/group chains (vs 4 tiny dots and ~20 transcendentals per step before).
    for t in range(T):
        g = (pf[t * B:(t + 1) * B, :]
             + pb[(T - 1 - t) * B:(T - t) * B, :]
             + jnp.dot(h, whh, preferred_element_type=jnp.float32))
        th = jnp.tanh(g)                 # single tanh over the full 256-lane gate block
        # sigmoid gates were pre-scaled by 0.5 in the weights: sigma(z) = 0.5*tanh(z/2)+0.5
        i_g = 0.5 * th[:, 0 * G:1 * G] + 0.5
        f_g = 0.5 * th[:, 1 * G:2 * G] + 0.5
        g_g = th[:, 2 * G:3 * G]
        o_g = 0.5 * th[:, 3 * G:4 * G] + 0.5
        c_new = f_g * c + i_g * g_g
        h_new = o_g * jnp.tanh(c_new)
        m = masks[t * B:(t + 1) * B, :]  # pure sublane slice, no per-step compares/casts
        h = h + m * (h_new - h)
        c = c + m * (c_new - c)
        acc = acc + m * h_new

    # count projection, 10 binary embeddings and final projection, all folded:
    #   acc @ w_seq  ==  concat([sum fwd, sum bwd]) of the active group @ pw_seq
    #   x   @ w_x    ==  (x @ count_w.T + count_b)                      @ pw_x
    #   tf  @ w_tf   ==  binary embedding lookups (rows0 + sel*diff)    @ pw_tfe
    o_ref[...] = (jnp.dot(acc, wseq_ref[...], preferred_element_type=jnp.float32)
                  + jnp.dot(x_ref[...], wx_ref[...], preferred_element_type=jnp.float32)
                  + jnp.dot(tf_ref[...], wtf_ref[...], preferred_element_type=jnp.float32)
                  + bout_ref[...])


# ----------------------------------------------------------------------------
# Parameters
# ----------------------------------------------------------------------------
def init_raw_params(key, *, d_hidden=32, d_count=10, n_feat=10):
    """Synthetic parameters in PyTorch layout (deterministic)."""
    kit = iter(jax.random.split(key, 64))

    def nrm(shape, s=0.1):
        return jax.random.normal(next(kit), shape, jnp.float32) * s

    H = d_hidden // 2

    def lstm(d_in):
        return dict(w_ih_f=nrm((4 * H, d_in)), w_hh_f=nrm((4 * H, H)),
                    b_ih_f=nrm((4 * H,)), b_hh_f=nrm((4 * H,)),
                    w_ih_b=nrm((4 * H, d_in)), w_hh_b=nrm((4 * H, H)),
                    b_ih_b=nrm((4 * H,)), b_hh_b=nrm((4 * H,)))

    base = d_hidden // n_feat
    widths = [base] * (n_feat - 1) + [d_hidden - base * (n_feat - 1)]
    return dict(clstm=lstm(D_SHORT), dlstm=lstm(D_LONG),
                count_w=nrm((d_hidden, d_count)), count_b=nrm((d_hidden,)),
                proj_w=nrm((d_hidden, 3 * d_hidden)), proj_b=nrm((d_hidden,)),
                tfe=[nrm((2, w)) for w in widths])


def prepare_params(raw, *, d_hidden=32, n_feat=10):
    """One-time prep: build the fused block-diagonal LSTM weights (sigmoid pre-scale
    folded in), and fold the count / tfe / final projections into three small matrices."""
    H = d_hidden // 2
    G = 4 * H                  # fused hidden width (4 chains)
    GW = 4 * G                 # fused gate width (i|f|g|o blocks)

    # chain order: 0=long-fwd, 1=short-fwd, 2=long-bwd, 3=short-bwd
    chains = [(raw['dlstm'], 'f', 0, D_LONG),
              (raw['clstm'], 'f', D_LONG, D_SHORT),
              (raw['dlstm'], 'b', 0, D_LONG),
              (raw['clstm'], 'b', D_LONG, D_SHORT)]
    gate_scale = [0.5, 0.5, 1.0, 0.5]      # PyTorch gate order [i, f, g, o]

    w_ih = np.zeros((D_IN, GW), np.float32)
    w_hh = np.zeros((G, GW), np.float32)
    bias = np.zeros((1, GW), np.float32)
    for ci, (p, d, off, d_in) in enumerate(chains):
        wi = np.asarray(p['w_ih_' + d], np.float32)                       # (4H, d_in)
        wh = np.asarray(p['w_hh_' + d], np.float32)                       # (4H, H)
        bb = (np.asarray(p['b_ih_' + d], np.float32)
              + np.asarray(p['b_hh_' + d], np.float32))                   # (4H,)
        for gi in range(4):
            s = gate_scale[gi]
            cols = slice(gi * G + ci * H, gi * G + (ci + 1) * H)
            w_ih[off:off + d_in, cols] = wi[gi * H:(gi + 1) * H, :].T * s
            w_hh[ci * H:(ci + 1) * H, cols] = wh[gi * H:(gi + 1) * H, :].T * s
            bias[0, cols] = bb[gi * H:(gi + 1) * H] * s

    fmask = np.zeros((1, GW), np.float32)   # forward-chain gate lanes (chains 0,1)
    for gi in range(4):
        fmask[0, gi * G: gi * G + 2 * H] = 1.0
    bmask = 1.0 - fmask

    # --- fold the tail of the module into the final projection -----------------------
    pw = np.asarray(raw['proj_w'], np.float32).T        # (3*d_hidden, d_hidden)
    pb = np.asarray(raw['proj_b'], np.float32)
    pw_x, pw_seq, pw_tfe = pw[:d_hidden], pw[d_hidden:2 * d_hidden], pw[2 * d_hidden:]

    cw = np.asarray(raw['count_w'], np.float32)          # (d_hidden, d_count)
    cb = np.asarray(raw['count_b'], np.float32)
    w_x = cw.T @ pw_x                                     # (d_count, d_hidden)

    # seq_emb = [sum fwd | sum bwd] of the ACTIVE group; inactive group accumulates 0,
    # so fold the selection+concat into a (4H, d_hidden) weight applied to acc directly.
    w_seq = np.concatenate([pw_seq[:H], pw_seq[:H], pw_seq[H:], pw_seq[H:]], axis=0)

    rows0 = np.concatenate([np.asarray(t, np.float32)[0] for t in raw['tfe']])
    rows1 = np.concatenate([np.asarray(t, np.float32)[1] for t in raw['tfe']])
    diff = rows1 - rows0
    base = d_hidden // n_feat
    widths = [base] * (n_feat - 1) + [d_hidden - base * (n_feat - 1)]
    E = np.zeros((n_feat, d_hidden), np.float32)
    col = 0
    for i, w in enumerate(widths):
        E[i, col:col + w] = 1.0
        col += w
    w_tf = E @ (diff[:, None] * pw_tfe)                   # (n_feat, d_hidden)
    b_out = (cb @ pw_x + rows0 @ pw_tfe + pb).reshape(1, -1)

    return dict(w_ih=jnp.asarray(w_ih), w_hh=jnp.asarray(w_hh), b=jnp.asarray(bias),
                fmask=jnp.asarray(fmask), bmask=jnp.asarray(bmask),
                w_x=jnp.asarray(w_x), w_seq=jnp.asarray(w_seq),
                w_tf=jnp.asarray(w_tf), b_out=jnp.asarray(b_out))


# ----------------------------------------------------------------------------
# Host-side ragged packing (shape-bucketed) + jitted dispatch (single pallas_call)
# ----------------------------------------------------------------------------
def _pack_inputs(x, sequences, long_masks, text_features_v2, H):
    x_np = np.asarray(x, np.float32)
    N, d_count = x_np.shape
    n_feat = len(text_features_v2)

    # Shape bucketing: padded batch / time rounded to powers of two (>= 8) so the jitted
    # pallas_call compiles once per bucket, not once per distinct input shape.
    Bp = max(8, 1 << max(N - 1, 0).bit_length())
    T_raw = max((int(np.asarray(s).shape[0]) for s in sequences), default=1)
    T = max(8, 1 << max(T_raw - 1, 0).bit_length())

    seq_all = np.zeros((T, Bp, D_IN), np.float32)
    mask = np.zeros((T, Bp, 4 * H), np.float32)
    t_idx = np.arange(T)[:, None]                    # (T, 1)
    for b, (s, lm) in enumerate(zip(sequences, long_masks)):
        s = np.asarray(s, np.float32)
        L = s.shape[0]
        if int(lm) == 1:
            seq_all[:L, b, :D_LONG] = s
            llong, lshort = L, 0
        else:
            seq_all[:L, b, D_LONG:] = s
            llong, lshort = 0, L
        mask[:, b, 0 * H:1 * H] = (t_idx < llong)               # long  fwd
        mask[:, b, 1 * H:2 * H] = (t_idx < lshort)              # short fwd
        mask[:, b, 2 * H:3 * H] = ((T - 1 - t_idx) < llong)     # long  bwd
        mask[:, b, 3 * H:4 * H] = ((T - 1 - t_idx) < lshort)    # short bwd

    xp = np.zeros((Bp, d_count), np.float32)
    xp[:N] = x_np
    tf = np.zeros((Bp, n_feat), np.float32)
    for i, t in enumerate(text_features_v2):
        tf[:N, i] = np.asarray(t, np.float32)

    return (jnp.asarray(seq_all.reshape(T * Bp, D_IN)),
            jnp.asarray(mask.reshape(T * Bp, 4 * H)),
            jnp.asarray(xp), jnp.asarray(tf), N)


@jax.jit
def _forward_core(seq, mask, x, tf, p):
    Bp = x.shape[0]
    d_hidden = p['w_seq'].shape[1]
    # Grid-less call: every operand is a full-array VMEM block (< 1.5 MiB resident).
    return pl.pallas_call(
        _node_embedding_kernel,
        out_shape=jax.ShapeDtypeStruct((Bp, d_hidden), jnp.float32),
    )(seq, mask, p['w_ih'], p['b'], p['w_hh'], p['fmask'], p['bmask'],
      x, tf, p['w_x'], p['w_seq'], p['w_tf'], p['b_out'])


def gspade_node_embedding_forward(prepared, x, sequences, masks, long_masks,
                                  text_features_v2, *, d_hidden=32):
    """Forward pass of GSpadeNodeEmbeddingBeta (eval).

    `masks` is accepted for signature parity but unused (the reference never reads it).
    Ragged sequence packing / long_mask routing is host-side numpy prep (the input is a
    Python list of per-node tensors), bucketed so the kernel does not recompile per call.
    """
    del masks
    H = d_hidden // 2
    seq, m, xp, tf, N = _pack_inputs(x, sequences, long_masks, text_features_v2, H)
    out = _forward_core(seq, m, xp, tf, prepared)
    return out[:N]


# ----------------------------------------------------------------------------
# Pure-JAX reference (mirrors the PyTorch module) for a correctness check.
# ----------------------------------------------------------------------------
def _reference_forward(raw, x, sequences, long_masks, text_features_v2, *, d_hidden):
    H = d_hidden // 2
    hp = jax.lax.Precision.HIGHEST

    def bilstm_sum(seq, p):
        def run(w_ih, w_hh, b_ih, b_hh, reverse):
            def step(carry, xt):
                h, c = carry
                g = (jnp.dot(xt, w_ih.T, precision=hp) + b_ih
                     + jnp.dot(h, w_hh.T, precision=hp) + b_hh)
                i = jax.nn.sigmoid(g[:H])
                f = jax.nn.sigmoid(g[H:2 * H])
                gg = jnp.tanh(g[2 * H:3 * H])
                o = jax.nn.sigmoid(g[3 * H:])
                c = f * c + i * gg
                h = o * jnp.tanh(c)
                return (h, c), h
            init = (jnp.zeros((H,), jnp.float32), jnp.zeros((H,), jnp.float32))
            _, hs = lax.scan(step, init, seq, reverse=reverse)
            return hs
        hf = run(p['w_ih_f'], p['w_hh_f'], p['b_ih_f'], p['b_hh_f'], False)
        hb = run(p['w_ih_b'], p['w_hh_b'], p['b_ih_b'], p['b_hh_b'], True)
        return jnp.concatenate([hf, hb], axis=-1).sum(axis=0)

    seq_emb = jnp.stack([bilstm_sum(jnp.asarray(s, jnp.float32),
                                    raw['dlstm'] if int(lm) == 1 else raw['clstm'])
                         for s, lm in zip(sequences, long_masks)])
    tfe = jnp.concatenate([raw['tfe'][i][jnp.asarray(t, jnp.int32)]
                           for i, t in enumerate(text_features_v2)], axis=-1)
    xc = jnp.dot(jnp.asarray(x, jnp.float32), raw['count_w'].T, precision=hp) + raw['count_b']
    h = jnp.concatenate([xc, seq_emb, tfe], axis=-1)
    return jnp.dot(h, raw['proj_w'].T, precision=hp) + raw['proj_b']


# ----------------------------------------------------------------------------
if __name__ == "__main__":
    D_HIDDEN, D_COUNT, N_FEAT = 32, 10, 10
    N = 8

    key = jax.random.PRNGKey(0)
    kp, kx, ks, kt = jax.random.split(key, 4)

    raw = init_raw_params(kp, d_hidden=D_HIDDEN, d_count=D_COUNT, n_feat=N_FEAT)
    prepared = prepare_params(raw, d_hidden=D_HIDDEN, n_feat=N_FEAT)

    long_masks = [1, 0, 1, 0, 0, 1, 0, 1]
    seq_lens = [3, 5, 4, 6, 3, 5, 4, 6]
    seq_keys = jax.random.split(ks, N)
    sequences = [
        jax.random.normal(seq_keys[i],
                          (seq_lens[i], D_LONG if long_masks[i] == 1 else D_SHORT),
                          jnp.float32) * 0.5
        for i in range(N)
    ]
    text_features_v2 = [
        jax.random.bernoulli(jax.random.fold_in(kt, i), 0.5, (N,)).astype(jnp.int32)
        for i in range(N_FEAT)
    ]
    x = jax.random.normal(kx, (N, D_COUNT), jnp.float32)

    out = gspade_node_embedding_forward(prepared, x, sequences, None, long_masks,
                                        text_features_v2, d_hidden=D_HIDDEN)
    out = jax.block_until_ready(out)
    assert out.shape == (N, D_HIDDEN) and out.dtype == jnp.float32
    assert bool(jnp.all(jnp.isfinite(out)))

    ref = _reference_forward(raw, x, sequences, long_masks, text_features_v2,
                             d_hidden=D_HIDDEN)
    ref = jax.block_until_ready(ref)
    max_err = float(jnp.max(jnp.abs(out - ref)))
    assert max_err < 2e-2, f"mismatch vs pure-JAX reference: max_err={max_err}"

    print("KERNEL_OK")
</pallas_src>

<mosaic_0001>
module attributes {stable_mosaic.version = 11 : i64} {
  func.func @_node_embedding_kernel(%arg0: memref<64x776xf32, #tpu.memory_space<vmem>>, %arg1: memref<64x64xf32, #tpu.memory_space<vmem>>, %arg2: memref<776x256xf32, #tpu.memory_space<vmem>>, %arg3: memref<1x256xf32, #tpu.memory_space<vmem>>, %arg4: memref<64x256xf32, #tpu.memory_space<vmem>>, %arg5: memref<1x256xf32, #tpu.memory_space<vmem>>, %arg6: memref<1x256xf32, #tpu.memory_space<vmem>>, %arg7: memref<8x10xf32, #tpu.memory_space<vmem>>, %arg8: memref<8x10xf32, #tpu.memory_space<vmem>>, %arg9: memref<10x32xf32, #tpu.memory_space<vmem>>, %arg10: memref<64x32xf32, #tpu.memory_space<vmem>>, %arg11: memref<10x32xf32, #tpu.memory_space<vmem>>, %arg12: memref<1x32xf32, #tpu.memory_space<vmem>>, %arg13: memref<8x32xf32, #tpu.memory_space<vmem>>) attributes {dimension_semantics = [], scalar_prefetch = 0 : i64, scratch_operands = 0 : i64, tpu.core_type = #tpu.core_type<tc>} {
    %c0 = arith.constant 0 : index
    %c0_0 = arith.constant 0 : index
    %0 = vector.load %arg4[%c0, %c0_0] : memref<64x256xf32, #tpu.memory_space<vmem>>, vector<64x256xf32>
    %c0_1 = arith.constant 0 : index
    %c0_2 = arith.constant 0 : index
    %1 = vector.load %arg0[%c0_1, %c0_2] : memref<64x776xf32, #tpu.memory_space<vmem>>, vector<64x776xf32>
    %c0_3 = arith.constant 0 : index
    %c0_4 = arith.constant 0 : index
    %2 = vector.load %arg2[%c0_3, %c0_4] : memref<776x256xf32, #tpu.memory_space<vmem>>, vector<776x256xf32>
    %cst = arith.constant dense<0.000000e+00> : vector<64x256xf32>
    %3 = tpu.matmul %1, %2, %cst {dimension_numbers = #tpu.dot_dimension_numbers<[1], [0], [0], [1], [0, 0, 1, 1], [], []>} : vector<64x776xf32>, vector<776x256xf32>, vector<64x256xf32> -> vector<64x256xf32>
    %c0_5 = arith.constant 0 : index
    %c0_6 = arith.constant 0 : index
    %4 = vector.load %arg3[%c0_5, %c0_6] : memref<1x256xf32, #tpu.memory_space<vmem>>, vector<1x256xf32>
    %5 = vector.broadcast %4 : vector<1x256xf32> to vector<64x256xf32>
    %6 = arith.addf %3, %5 : vector<64x256xf32>
    %c0_7 = arith.constant 0 : index
    %c0_8 = arith.constant 0 : index
    %7 = vector.load %arg5[%c0_7, %c0_8] : memref<1x256xf32, #tpu.memory_space<vmem>>, vector<1x256xf32>
    %8 = vector.broadcast %7 : vector<1x256xf32> to vector<64x256xf32>
    %9 = arith.mulf %6, %8 : vector<64x256xf32>
    %c0_9 = arith.constant 0 : index
    %c0_10 = arith.constant 0 : index
    %10 = vector.load %arg6[%c0_9, %c0_10] : memref<1x256xf32, #tpu.memory_space<vmem>>, vector<1x256xf32>
    %11 = vector.broadcast %10 : vector<1x256xf32> to vector<64x256xf32>
    %12 = arith.mulf %6, %11 : vector<64x256xf32>
    %c0_11 = arith.constant 0 : index
    %c0_12 = arith.constant 0 : index
    %13 = vector.load %arg1[%c0_11, %c0_12] : memref<64x64xf32, #tpu.memory_space<vmem>>, vector<64x64xf32>
    %cst_13 = arith.constant 0.000000e+00 : f32
    %14 = vector.broadcast %cst_13 : f32 to vector<8x64xf32>
    %cst_14 = arith.constant 0.000000e+00 : f32
    %15 = vector.broadcast %cst_14 : f32 to vector<8x64xf32>
    %cst_15 = arith.constant 0.000000e+00 : f32
    %16 = vector.broadcast %cst_15 : f32 to vector<8x64xf32>
    %17 = vector.extract_strided_slice %9 {offsets = [0, 0], sizes = [8, 256], strides = [1, 1]} : vector<64x256xf32> to vector<8x256xf32>
    %18 = vector.extract_strided_slice %12 {offsets = [56, 0], sizes = [8, 256], strides = [1, 1]} : vector<64x256xf32> to vector<8x256xf32>
    %19 = arith.addf %17, %18 : vector<8x256xf32>
    %cst_16 = arith.constant dense<0.000000e+00> : vector<8x256xf32>
    %20 = tpu.matmul %14, %0, %cst_16 {dimension_numbers = #tpu.dot_dimension_numbers<[1], [0], [0], [1], [0, 0, 1, 1], [], []>} : vector<8x64xf32>, vector<64x256xf32>, vector<8x256xf32> -> vector<8x256xf32>
    %21 = arith.addf %19, %20 : vector<8x256xf32>
    %22 = math.tanh %21 : vector<8x256xf32>
    %23 = vector.extract_strided_slice %22 {offsets = [0, 0], sizes = [8, 64], strides = [1, 1]} : vector<8x256xf32> to vector<8x64xf32>
    %cst_17 = arith.constant 5.000000e-01 : f32
    %24 = vector.broadcast %cst_17 : f32 to vector<8x64xf32>
    %25 = arith.mulf %24, %23 : vector<8x64xf32>
    %cst_18 = arith.constant 5.000000e-01 : f32
    %26 = vector.broadcast %cst_18 : f32 to vector<8x64xf32>
    %27 = arith.addf %25, %26 : vector<8x64xf32>
    %28 = vector.extract_strided_slice %22 {offsets = [0, 64], sizes = [8, 64], strides = [1, 1]} : vector<8x256xf32> to vector<8x64xf32>
    %cst_19 = arith.constant 5.000000e-01 : f32
    %29 = vector.broadcast %cst_19 : f32 to vector<8x64xf32>
    %30 = arith.mulf %29, %28 : vector<8x64xf32>
    %cst_20 = arith.constant 5.000000e-01 : f32
    %31 = vector.broadcast %cst_20 : f32 to vector<8x64xf32>
    %32 = arith.addf %30, %31 : vector<8x64xf32>
    %33 = vector.extract_strided_slice %22 {offsets = [0, 128], sizes = [8, 64], strides = [1, 1]} : vector<8x256xf32> to vector<8x64xf32>
    %34 = vector.extract_strided_slice %22 {offsets = [0, 192], sizes = [8, 64], strides = [1, 1]} : vector<8x256xf32> to vector<8x64xf32>
    %cst_21 = arith.constant 5.000000e-01 : f32
    %35 = vector.broadcast %cst_21 : f32 to vector<8x64xf32>
    %36 = arith.mulf %35, %34 : vector<8x64xf32>
    %cst_22 = arith.constant 5.000000e-01 : f32
    %37 = vector.broadcast %cst_22 : f32 to vector<8x64xf32>
    %38 = arith.addf %36, %37 : vector<8x64xf32>
    %39 = arith.mulf %32, %15 : vector<8x64xf32>
    %40 = arith.mulf %27, %33 : vector<8x64xf32>
    %41 = arith.addf %39, %40 : vector<8x64xf32>
    %42 = math.tanh %41 : vector<8x64xf32>
    %43 = arith.mulf %38, %42 : vector<8x64xf32>
    %44 = vector.extract_strided_slice %13 {offsets = [0, 0], sizes = [8, 64], strides = [1, 1]} : vector<64x64xf32> to vector<8x64xf32>
    %45 = arith.subf %43, %14 : vector<8x64xf32>
    %46 = arith.mulf %44, %45 : vector<8x64xf32>
    %47 = arith.addf %14, %46 : vector<8x64xf32>
    %48 = arith.subf %41, %15 : vector<8x64xf32>
    %49 = arith.mulf %44, %48 : vector<8x64xf32>
    %50 = arith.addf %15, %49 : vector<8x64xf32>
    %51 = arith.mulf %44, %43 : vector<8x64xf32>
    %52 = arith.addf %16, %51 : vector<8x64xf32>
    %53 = vector.extract_strided_slice %9 {offsets = [8, 0], sizes = [8, 256], strides = [1, 1]} : vector<64x256xf32> to vector<8x256xf32>
    %54 = vector.extract_strided_slice %12 {offsets = [48, 0], sizes = [8, 256], strides = [1, 1]} : vector<64x256xf32> to vector<8x256xf32>
    %55 = arith.addf %53, %54 : vector<8x256xf32>
    %cst_23 = arith.constant dense<0.000000e+00> : vector<8x256xf32>
    %56 = tpu.matmul %47, %0, %cst_23 {dimension_numbers = #tpu.dot_dimension_numbers<[1], [0], [0], [1], [0, 0, 1, 1], [], []>} : vector<8x64xf32>, vector<64x256xf32>, vector<8x256xf32> -> vector<8x256xf32>
    %57 = arith.addf %55, %56 : vector<8x256xf32>
    %58 = math.tanh %57 : vector<8x256xf32>
    %59 = vector.extract_strided_slice %58 {offsets = [0, 0], sizes = [8, 64], strides = [1, 1]} : vector<8x256xf32> to vector<8x64xf32>
    %cst_24 = arith.constant 5.000000e-01 : f32
    %60 = vector.broadcast %cst_24 : f32 to vector<8x64xf32>
    %61 = arith.mulf %60, %59 : vector<8x64xf32>
    %cst_25 = arith.constant 5.000000e-01 : f32
    %62 = vector.broadcast %cst_25 : f32 to vector<8x64xf32>
    %63 = arith.addf %61, %62 : vector<8x64xf32>
    %64 = vector.extract_strided_slice %58 {offsets = [0, 64], sizes = [8, 64], strides = [1, 1]} : vector<8x256xf32> to vector<8x64xf32>
    %cst_26 = arith.constant 5.000000e-01 : f32
    %65 = vector.broadcast %cst_26 : f32 to vector<8x64xf32>
    %66 = arith.mulf %65, %64 : vector<8x64xf32>
    %cst_27 = arith.constant 5.000000e-01 : f32
    %67 = vector.broadcast %cst_27 : f32 to vector<8x64xf32>
    %68 = arith.addf %66, %67 : vector<8x64xf32>
    %69 = vector.extract_strided_slice %58 {offsets = [0, 128], sizes = [8, 64], strides = [1, 1]} : vector<8x256xf32> to vector<8x64xf32>
    %70 = vector.extract_strided_slice %58 {offsets = [0, 192], sizes = [8, 64], strides = [1, 1]} : vector<8x256xf32> to vector<8x64xf32>
    %cst_28 = arith.constant 5.000000e-01 : f32
    %71 = vector.broadcast %cst_28 : f32 to vector<8x64xf32>
    %72 = arith.mulf %71, %70 : vector<8x64xf32>
    %cst_29 = arith.constant 5.000000e-01 : f32
    %73 = vector.broadcast %cst_29 : f32 to vector<8x64xf32>
    %74 = arith.addf %72, %73 : vector<8x64xf32>
    %75 = arith.mulf %68, %50 : vector<8x64xf32>
    %76 = arith.mulf %63, %69 : vector<8x64xf32>
    %77 = arith.addf %75, %76 : vector<8x64xf32>
    %78 = math.tanh %77 : vector<8x64xf32>
    %79 = arith.mulf %74, %78 : vector<8x64xf32>
    %80 = vector.extract_strided_slice %13 {offsets = [8, 0], sizes = [8, 64], strides = [1, 1]} : vector<64x64xf32> to vector<8x64xf32>
    %81 = arith.subf %79, %47 : vector<8x64xf32>
    %82 = arith.mulf %80, %81 : vector<8x64xf32>
    %83 = arith.addf %47, %82 : vector<8x64xf32>
    %84 = arith.subf %77, %50 : vector<8x64xf32>
    %85 = arith.mulf %80, %84 : vector<8x64xf32>
    %86 = arith.addf %50, %85 : vector<8x64xf32>
    %87 = arith.mulf %80, %79 : vector<8x64xf32>
    %88 = arith.addf %52, %87 : vector<8x64xf32>
    %89 = vector.extract_strided_slice %9 {offsets = [16, 0], sizes = [8, 256], strides = [1, 1]} : vector<64x256xf32> to vector<8x256xf32>
    %90 = vector.extract_strided_slice %12 {offsets = [40, 0], sizes = [8, 256], strides = [1, 1]} : vector<64x256xf32> to vector<8x256xf32>
    %91 = arith.addf %89, %90 : vector<8x256xf32>
    %cst_30 = arith.constant dense<0.000000e+00> : vector<8x256xf32>
    %92 = tpu.matmul %83, %0, %cst_30 {dimension_numbers = #tpu.dot_dimension_numbers<[1], [0], [0], [1], [0, 0, 1, 1], [], []>} : vector<8x64xf32>, vector<64x256xf32>, vector<8x256xf32> -> vector<8x256xf32>
    %93 = arith.addf %91, %92 : vector<8x256xf32>
    %94 = math.tanh %93 : vector<8x256xf32>
    %95 = vector.extract_strided_slice %94 {offsets = [0, 0], sizes = [8, 64], strides = [1, 1]} : vector<8x256xf32> to vector<8x64xf32>
    %cst_31 = arith.constant 5.000000e-01 : f32
    %96 = vector.broadcast %cst_31 : f32 to vector<8x64xf32>
    %97 = arith.mulf %96, %95 : vector<8x64xf32>
    %cst_32 = arith.constant 5.000000e-01 : f32
    %98 = vector.broadcast %cst_32 : f32 to vector<8x64xf32>
    %99 = arith.addf %97, %98 : vector<8x64xf32>
    %100 = vector.extract_strided_slice %94 {offsets = [0, 64], sizes = [8, 64], strides = [1, 1]} : vector<8x256xf32> to vector<8x64xf32>
    %cst_33 = arith.constant 5.000000e-01 : f32
    %101 = vector.broadcast %cst_33 : f32 to vector<8x64xf32>
    %102 = arith.mulf %101, %100 : vector<8x64xf32>
    %cst_34 = arith.constant 5.000000e-01 : f32
    %103 = vector.broadcast %cst_34 : f32 to vector<8x64xf32>
    %104 = arith.addf %102, %103 : vector<8x64xf32>
    %105 = vector.extract_strided_slice %94 {offsets = [0, 128], sizes = [8, 64], strides = [1, 1]} : vector<8x256xf32> to vector<8x64xf32>
    %106 = vector.extract_strided_slice %94 {offsets = [0, 192], sizes = [8, 64], strides = [1, 1]} : vector<8x256xf32> to vector<8x64xf32>
    %cst_35 = arith.constant 5.000000e-01 : f32
    %107 = vector.broadcast %cst_35 : f32 to vector<8x64xf32>
    %108 = arith.mulf %107, %106 : vector<8x64xf32>
    %cst_36 = arith.constant 5.000000e-01 : f32
    %109 = vector.broadcast %cst_36 : f32 to vector<8x64xf32>
    %110 = arith.addf %108, %109 : vector<8x64xf32>
    %111 = arith.mulf %104, %86 : vector<8x64xf32>
    %112 = arith.mulf %99, %105 : vector<8x64xf32>
    %113 = arith.addf %111, %112 : vector<8x64xf32>
    %114 = math.tanh %113 : vector<8x64xf32>
    %115 = arith.mulf %110, %114 : vector<8x64xf32>
    %116 = vector.extract_strided_slice %13 {offsets = [16, 0], sizes = [8, 64], strides = [1, 1]} : vector<64x64xf32> to vector<8x64xf32>
    %117 = arith.subf %115, %83 : vector<8x64xf32>
    %118 = arith.mulf %116, %117 : vector<8x64xf32>
    %119 = arith.addf %83, %118 : vector<8x64xf32>
    %120 = arith.subf %113, %86 : vector<8x64xf32>
    %121 = arith.mulf %116, %120 : vector<8x64xf32>
    %122 = arith.addf %86, %121 : vector<8x64xf32>
    %123 = arith.mulf %116, %115 : vector<8x64xf32>
    %124 = arith.addf %88, %123 : vector<8x64xf32>
    %125 = vector.extract_strided_slice %9 {offsets = [24, 0], sizes = [8, 256], strides = [1, 1]} : vector<64x256xf32> to vector<8x256xf32>
    %126 = vector.extract_strided_slice %12 {offsets = [32, 0], sizes = [8, 256], strides = [1, 1]} : vector<64x256xf32> to vector<8x256xf32>
    %127 = arith.addf %125, %126 : vector<8x256xf32>
    %cst_37 = arith.constant dense<0.000000e+00> : vector<8x256xf32>
    %128 = tpu.matmul %119, %0, %cst_37 {dimension_numbers = #tpu.dot_dimension_numbers<[1], [0], [0], [1], [0, 0, 1, 1], [], []>} : vector<8x64xf32>, vector<64x256xf32>, vector<8x256xf32> -> vector<8x256xf32>
    %129 = arith.addf %127, %128 : vector<8x256xf32>
    %130 = math.tanh %129 : vector<8x256xf32>
    %131 = vector.extract_strided_slice %130 {offsets = [0, 0], sizes = [8, 64], strides = [1, 1]} : vector<8x256xf32> to vector<8x64xf32>
    %cst_38 = arith.constant 5.000000e-01 : f32
    %132 = vector.broadcast %cst_38 : f32 to vector<8x64xf32>
    %133 = arith.mulf %132, %131 : vector<8x64xf32>
    %cst_39 = arith.constant 5.000000e-01 : f32
    %134 = vector.broadcast %cst_39 : f32 to vector<8x64xf32>
    %135 = arith.addf %133, %134 : vector<8x64xf32>
    %136 = vector.extract_strided_slice %130 {offsets = [0, 64], sizes = [8, 64], strides = [1, 1]} : vector<8x256xf32> to vector<8x64xf32>
    %cst_40 = arith.constant 5.000000e-01 : f32
    %137 = vector.broadcast %cst_40 : f32 to vector<8x64xf32>
    %138 = arith.mulf %137, %136 : vector<8x64xf32>
    %cst_41 = arith.constant 5.000000e-01 : f32
    %139 = vector.broadcast %cst_41 : f32 to vector<8x64xf32>
    %140 = arith.addf %138, %139 : vector<8x64xf32>
    %141 = vector.extract_strided_slice %130 {offsets = [0, 128], sizes = [8, 64], strides = [1, 1]} : vector<8x256xf32> to vector<8x64xf32>
    %142 = vector.extract_strided_slice %130 {offsets = [0, 192], sizes = [8, 64], strides = [1, 1]} : vector<8x256xf32> to vector<8x64xf32>
    %cst_42 = arith.constant 5.000000e-01 : f32
    %143 = vector.broadcast %cst_42 : f32 to vector<8x64xf32>
    %144 = arith.mulf %143, %142 : vector<8x64xf32>
    %cst_43 = arith.constant 5.000000e-01 : f32
    %145 = vector.broadcast %cst_43 : f32 to vector<8x64xf32>
    %146 = arith.addf %144, %145 : vector<8x64xf32>
    %147 = arith.mulf %140, %122 : vector<8x64xf32>
    %148 = arith.mulf %135, %141 : vector<8x64xf32>
    %149 = arith.addf %147, %148 : vector<8x64xf32>
    %150 = math.tanh %149 : vector<8x64xf32>
    %151 = arith.mulf %146, %150 : vector<8x64xf32>
    %152 = vector.extract_strided_slice %13 {offsets = [24, 0], sizes = [8, 64], strides = [1, 1]} : vector<64x64xf32> to vector<8x64xf32>
    %153 = arith.subf %151, %119 : vector<8x64xf32>
    %154 = arith.mulf %152, %153 : vector<8x64xf32>
    %155 = arith.addf %119, %154 : vector<8x64xf32>
    %156 = arith.subf %149, %122 : vector<8x64xf32>
    %157 = arith.mulf %152, %156 : vector<8x64xf32>
    %158 = arith.addf %122, %157 : vector<8x64xf32>
    %159 = arith.mulf %152, %151 : vector<8x64xf32>
    %160 = arith.addf %124, %159 : vector<8x64xf32>
    %161 = vector.extract_strided_slice %9 {offsets = [32, 0], sizes = [8, 256], strides = [1, 1]} : vector<64x256xf32> to vector<8x256xf32>
    %162 = vector.extract_strided_slice %12 {offsets = [24, 0], sizes = [8, 256], strides = [1, 1]} : vector<64x256xf32> to vector<8x256xf32>
    %163 = arith.addf %161, %162 : vector<8x256xf32>
    %cst_44 = arith.constant dense<0.000000e+00> : vector<8x256xf32>
    %164 = tpu.matmul %155, %0, %cst_44 {dimension_numbers = #tpu.dot_dimension_numbers<[1], [0], [0], [1], [0, 0, 1, 1], [], []>} : vector<8x64xf32>, vector<64x256xf32>, vector<8x256xf32> -> vector<8x256xf32>
    %165 = arith.addf %163, %164 : vector<8x256xf32>
    %166 = math.tanh %165 : vector<8x256xf32>
    %167 = vector.extract_strided_slice %166 {offsets = [0, 0], sizes = [8, 64], strides = [1, 1]} : vector<8x256xf32> to vector<8x64xf32>
    %cst_45 = arith.constant 5.000000e-01 : f32
    %168 = vector.broadcast %cst_45 : f32 to vector<8x64xf32>
    %169 = arith.mulf %168, %167 : vector<8x64xf32>
    %cst_46 = arith.constant 5.000000e-01 : f32
    %170 = vector.broadcast %cst_46 : f32 to vector<8x64xf32>
    %171 = arith.addf %169, %170 : vector<8x64xf32>
    %172 = vector.extract_strided_slice %166 {offsets = [0, 64], sizes = [8, 64], strides = [1, 1]} : vector<8x256xf32> to vector<8x64xf32>
    %cst_47 = arith.constant 5.000000e-01 : f32
    %173 = vector.broadcast %cst_47 : f32 to vector<8x64xf32>
    %174 = arith.mulf %173, %172 : vector<8x64xf32>
    %cst_48 = arith.constant 5.000000e-01 : f32
    %175 = vector.broadcast %cst_48 : f32 to vector<8x64xf32>
    %176 = arith.addf %174, %175 : vector<8x64xf32>
    %177 = vector.extract_strided_slice %166 {offsets = [0, 128], sizes = [8, 64], strides = [1, 1]} : vector<8x256xf32> to vector<8x64xf32>
    %178 = vector.extract_strided_slice %166 {offsets = [0, 192], sizes = [8, 64], strides = [1, 1]} : vector<8x256xf32> to vector<8x64xf32>
    %cst_49 = arith.constant 5.000000e-01 : f32
    %179 = vector.broadcast %cst_49 : f32 to vector<8x64xf32>
    %180 = arith.mulf %179, %178 : vector<8x64xf32>
    %cst_50 = arith.constant 5.000000e-01 : f32
    %181 = vector.broadcast %cst_50 : f32 to vector<8x64xf32>
    %182 = arith.addf %180, %181 : vector<8x64xf32>
    %183 = arith.mulf %176, %158 : vector<8x64xf32>
    %184 = arith.mulf %171, %177 : vector<8x64xf32>
    %185 = arith.addf %183, %184 : vector<8x64xf32>
    %186 = math.tanh %185 : vector<8x64xf32>
    %187 = arith.mulf %182, %186 : vector<8x64xf32>
    %188 = vector.extract_strided_slice %13 {offsets = [32, 0], sizes = [8, 64], strides = [1, 1]} : vector<64x64xf32> to vector<8x64xf32>
    %189 = arith.subf %187, %155 : vector<8x64xf32>
    %190 = arith.mulf %188, %189 : vector<8x64xf32>
    %191 = arith.addf %155, %190 : vector<8x64xf32>
    %192 = arith.subf %185, %158 : vector<8x64xf32>
    %193 = arith.mulf %188, %192 : vector<8x64xf32>
    %194 = arith.addf %158, %193 : vector<8x64xf32>
    %195 = arith.mulf %188, %187 : vector<8x64xf32>
    %196 = arith.addf %160, %195 : vector<8x64xf32>
    %197 = vector.extract_strided_slice %9 {offsets = [40, 0], sizes = [8, 256], strides = [1, 1]} : vector<64x256xf32> to vector<8x256xf32>
    %198 = vector.extract_strided_slice %12 {offsets = [16, 0], sizes = [8, 256], strides = [1, 1]} : vector<64x256xf32> to vector<8x256xf32>
    %199 = arith.addf %197, %198 : vector<8x256xf32>
    %cst_51 = arith.constant dense<0.000000e+00> : vector<8x256xf32>
    %200 = tpu.matmul %191, %0, %cst_51 {dimension_numbers = #tpu.dot_dimension_numbers<[1], [0], [0], [1], [0, 0, 1, 1], [], []>} : vector<8x64xf32>, vector<64x256xf32>, vector<8x256xf32> -> vector<8x256xf32>
    %201 = arith.addf %199, %200 : vector<8x256xf32>
    %202 = math.tanh %201 : vector<8x256xf32>
    %203 = vector.extract_strided_slice %202 {offsets = [0, 0], sizes = [8, 64], strides = [1, 1]} : vector<8x256xf32> to vector<8x64xf32>
    %cst_52 = arith.constant 5.000000e-01 : f32
    %204 = vector.broadcast %cst_52 : f32 to vector<8x64xf32>
    %205 = arith.mulf %204, %203 : vector<8x64xf32>
    %cst_53 = arith.constant 5.000000e-01 : f32
    %206 = vector.broadcast %cst_53 : f32 to vector<8x64xf32>
    %207 = arith.addf %205, %206 : vector<8x64xf32>
    %208 = vector.extract_strided_slice %202 {offsets = [0, 64], sizes = [8, 64], strides = [1, 1]} : vector<8x256xf32> to vector<8x64xf32>
    %cst_54 = arith.constant 5.000000e-01 : f32
    %209 = vector.broadcast %cst_54 : f32 to vector<8x64xf32>
    %210 = arith.mulf %209, %208 : vector<8x64xf32>
    %cst_55 = arith.constant 5.000000e-01 : f32
    %211 = vector.broadcast %cst_55 : f32 to vector<8x64xf32>
    %212 = arith.addf %210, %211 : vector<8x64xf32>
    %213 = vector.extract_strided_slice %202 {offsets = [0, 128], sizes = [8, 64], strides = [1, 1]} : vector<8x256xf32> to vector<8x64xf32>
    %214 = vector.extract_strided_slice %202 {offsets = [0, 192], sizes = [8, 64], strides = [1, 1]} : vector<8x256xf32> to vector<8x64xf32>
    %cst_56 = arith.constant 5.000000e-01 : f32
    %215 = vector.broadcast %cst_56 : f32 to vector<8x64xf32>
    %216 = arith.mulf %215, %214 : vector<8x64xf32>
    %cst_57 = arith.constant 5.000000e-01 : f32
    %217 = vector.broadcast %cst_57 : f32 to vector<8x64xf32>
    %218 = arith.addf %216, %217 : vector<8x64xf32>
    %219 = arith.mulf %212, %194 : vector<8x64xf32>
    %220 = arith.mulf %207, %213 : vector<8x64xf32>
    %221 = arith.addf %219, %220 : vector<8x64xf32>
    %222 = math.tanh %221 : vector<8x64xf32>
    %223 = arith.mulf %218, %222 : vector<8x64xf32>
    %224 = vector.extract_strided_slice %13 {offsets = [40, 0], sizes = [8, 64], strides = [1, 1]} : vector<64x64xf32> to vector<8x64xf32>
    %225 = arith.subf %223, %191 : vector<8x64xf32>
    %226 = arith.mulf %224, %225 : vector<8x64xf32>
    %227 = arith.addf %191, %226 : vector<8x64xf32>
    %228 = arith.subf %221, %194 : vector<8x64xf32>
    %229 = arith.mulf %224, %228 : vector<8x64xf32>
    %230 = arith.addf %194, %229 : vector<8x64xf32>
    %231 = arith.mulf %224, %223 : vector<8x64xf32>
    %232 = arith.addf %196, %231 : vector<8x64xf32>
    %233 = vector.extract_strided_slice %9 {offsets = [48, 0], sizes = [8, 256], strides = [1, 1]} : vector<64x256xf32> to vector<8x256xf32>
    %234 = vector.extract_strided_slice %12 {offsets = [8, 0], sizes = [8, 256], strides = [1, 1]} : vector<64x256xf32> to vector<8x256xf32>
    %235 = arith.addf %233, %234 : vector<8x256xf32>
    %cst_58 = arith.constant dense<0.000000e+00> : vector<8x256xf32>
    %236 = tpu.matmul %227, %0, %cst_58 {dimension_numbers = #tpu.dot_dimension_numbers<[1], [0], [0], [1], [0, 0, 1, 1], [], []>} : vector<8x64xf32>, vector<64x256xf32>, vector<8x256xf32> -> vector<8x256xf32>
    %237 = arith.addf %235, %236 : vector<8x256xf32>
    %238 = math.tanh %237 : vector<8x256xf32>
    %239 = vector.extract_strided_slice %238 {offsets = [0, 0], sizes = [8, 64], strides = [1, 1]} : vector<8x256xf32> to vector<8x64xf32>
    %cst_59 = arith.constant 5.000000e-01 : f32
    %240 = vector.broadcast %cst_59 : f32 to vector<8x64xf32>
    %241 = arith.mulf %240, %239 : vector<8x64xf32>
    %cst_60 = arith.constant 5.000000e-01 : f32
    %242 = vector.broadcast %cst_60 : f32 to vector<8x64xf32>
    %243 = arith.addf %241, %242 : vector<8x64xf32>
    %244 = vector.extract_strided_slice %238 {offsets = [0, 64], sizes = [8, 64], strides = [1, 1]} : vector<8x256xf32> to vector<8x64xf32>
    %cst_61 = arith.constant 5.000000e-01 : f32
    %245 = vector.broadcast %cst_61 : f32 to vector<8x64xf32>
    %246 = arith.mulf %245, %244 : vector<8x64xf32>
    %cst_62 = arith.constant 5.000000e-01 : f32
    %247 = vector.broadcast %cst_62 : f32 to vector<8x64xf32>
    %248 = arith.addf %246, %247 : vector<8x64xf32>
    %249 = vector.extract_strided_slice %238 {offsets = [0, 128], sizes = [8, 64], strides = [1, 1]} : vector<8x256xf32> to vector<8x64xf32>
    %250 = vector.extract_strided_slice %238 {offsets = [0, 192], sizes = [8, 64], strides = [1, 1]} : vector<8x256xf32> to vector<8x64xf32>
    %cst_63 = arith.constant 5.000000e-01 : f32
    %251 = vector.broadcast %cst_63 : f32 to vector<8x64xf32>
    %252 = arith.mulf %251, %250 : vector<8x64xf32>
    %cst_64 = arith.constant 5.000000e-01 : f32
    %253 = vector.broadcast %cst_64 : f32 to vector<8x64xf32>
    %254 = arith.addf %252, %253 : vector<8x64xf32>
    %255 = arith.mulf %248, %230 : vector<8x64xf32>
    %256 = arith.mulf %243, %249 : vector<8x64xf32>
    %257 = arith.addf %255, %256 : vector<8x64xf32>
    %258 = math.tanh %257 : vector<8x64xf32>
    %259 = arith.mulf %254, %258 : vector<8x64xf32>
    %260 = vector.extract_strided_slice %13 {offsets = [48, 0], sizes = [8, 64], strides = [1, 1]} : vector<64x64xf32> to vector<8x64xf32>
    %261 = arith.subf %259, %227 : vector<8x64xf32>
    %262 = arith.mulf %260, %261 : vector<8x64xf32>
    %263 = arith.addf %227, %262 : vector<8x64xf32>
    %264 = arith.subf %257, %230 : vector<8x64xf32>
    %265 = arith.mulf %260, %264 : vector<8x64xf32>
    %266 = arith.addf %230, %265 : vector<8x64xf32>
    %267 = arith.mulf %260, %259 : vector<8x64xf32>
    %268 = arith.addf %232, %267 : vector<8x64xf32>
    %269 = vector.extract_strided_slice %9 {offsets = [56, 0], sizes = [8, 256], strides = [1, 1]} : vector<64x256xf32> to vector<8x256xf32>
    %270 = vector.extract_strided_slice %12 {offsets = [0, 0], sizes = [8, 256], strides = [1, 1]} : vector<64x256xf32> to vector<8x256xf32>
    %271 = arith.addf %269, %270 : vector<8x256xf32>
    %cst_65 = arith.constant dense<0.000000e+00> : vector<8x256xf32>
    %272 = tpu.matmul %263, %0, %cst_65 {dimension_numbers = #tpu.dot_dimension_numbers<[1], [0], [0], [1], [0, 0, 1, 1], [], []>} : vector<8x64xf32>, vector<64x256xf32>, vector<8x256xf32> -> vector<8x256xf32>
    %273 = arith.addf %271, %272 : vector<8x256xf32>
    %274 = math.tanh %273 : vector<8x256xf32>
    %275 = vector.extract_strided_slice %274 {offsets = [0, 0], sizes = [8, 64], strides = [1, 1]} : vector<8x256xf32> to vector<8x64xf32>
    %cst_66 = arith.constant 5.000000e-01 : f32
    %276 = vector.broadcast %cst_66 : f32 to vector<8x64xf32>
    %277 = arith.mulf %276, %275 : vector<8x64xf32>
    %cst_67 = arith.constant 5.000000e-01 : f32
    %278 = vector.broadcast %cst_67 : f32 to vector<8x64xf32>
    %279 = arith.addf %277, %278 : vector<8x64xf32>
    %280 = vector.extract_strided_slice %274 {offsets = [0, 64], sizes = [8, 64], strides = [1, 1]} : vector<8x256xf32> to vector<8x64xf32>
    %cst_68 = arith.constant 5.000000e-01 : f32
    %281 = vector.broadcast %cst_68 : f32 to vector<8x64xf32>
    %282 = arith.mulf %281, %280 : vector<8x64xf32>
    %cst_69 = arith.constant 5.000000e-01 : f32
    %283 = vector.broadcast %cst_69 : f32 to vector<8x64xf32>
    %284 = arith.addf %282, %283 : vector<8x64xf32>
    %285 = vector.extract_strided_slice %274 {offsets = [0, 128], sizes = [8, 64], strides = [1, 1]} : vector<8x256xf32> to vector<8x64xf32>
    %286 = vector.extract_strided_slice %274 {offsets = [0, 192], sizes = [8, 64], strides = [1, 1]} : vector<8x256xf32> to vector<8x64xf32>
    %cst_70 = arith.constant 5.000000e-01 : f32
    %287 = vector.broadcast %cst_70 : f32 to vector<8x64xf32>
    %288 = arith.mulf %287, %286 : vector<8x64xf32>
    %cst_71 = arith.constant 5.000000e-01 : f32
    %289 = vector.broadcast %cst_71 : f32 to vector<8x64xf32>
    %290 = arith.addf %288, %289 : vector<8x64xf32>
    %291 = arith.mulf %284, %266 : vector<8x64xf32>
    %292 = arith.mulf %279, %285 : vector<8x64xf32>
    %293 = arith.addf %291, %292 : vector<8x64xf32>
    %294 = math.tanh %293 : vector<8x64xf32>
    %295 = arith.mulf %290, %294 : vector<8x64xf32>
    %296 = vector.extract_strided_slice %13 {offsets = [56, 0], sizes = [8, 64], strides = [1, 1]} : vector<64x64xf32> to vector<8x64xf32>
    %297 = arith.mulf %296, %295 : vector<8x64xf32>
    %298 = arith.addf %268, %297 : vector<8x64xf32>
    %c0_72 = arith.constant 0 : index
    %c0_73 = arith.constant 0 : index
    %299 = vector.load %arg10[%c0_72, %c0_73] : memref<64x32xf32, #tpu.memory_space<vmem>>, vector<64x32xf32>
    %cst_74 = arith.constant dense<0.000000e+00> : vector<8x32xf32>
    %300 = tpu.matmul %298, %299, %cst_74 {dimension_numbers = #tpu.dot_dimension_numbers<[1], [0], [0], [1], [0, 0, 1, 1], [], []>} : vector<8x64xf32>, vector<64x32xf32>, vector<8x32xf32> -> vector<8x32xf32>
    %c0_75 = arith.constant 0 : index
    %c0_76 = arith.constant 0 : index
    %301 = vector.load %arg7[%c0_75, %c0_76] : memref<8x10xf32, #tpu.memory_space<vmem>>, vector<8x10xf32>
    %c0_77 = arith.constant 0 : index
    %c0_78 = arith.constant 0 : index
    %302 = vector.load %arg9[%c0_77, %c0_78] : memref<10x32xf32, #tpu.memory_space<vmem>>, vector<10x32xf32>
    %cst_79 = arith.constant dense<0.000000e+00> : vector<8x32xf32>
    %303 = tpu.matmul %301, %302, %cst_79 {dimension_numbers = #tpu.dot_dimension_numbers<[1], [0], [0], [1], [0, 0, 1, 1], [], []>} : vector<8x10xf32>, vector<10x32xf32>, vector<8x32xf32> -> vector<8x32xf32>
    %304 = arith.addf %300, %303 : vector<8x32xf32>
    %c0_80 = arith.constant 0 : index
    %c0_81 = arith.constant 0 : index
    %305 = vector.load %arg8[%c0_80, %c0_81] : memref<8x10xf32, #tpu.memory_space<vmem>>, vector<8x10xf32>
    %c0_82 = arith.constant 0 : index
    %c0_83 = arith.constant 0 : index
    %306 = vector.load %arg11[%c0_82, %c0_83] : memref<10x32xf32, #tpu.memory_space<vmem>>, vector<10x32xf32>
    %cst_84 = arith.constant dense<0.000000e+00> : vector<8x32xf32>
    %307 = tpu.matmul %305, %306, %cst_84 {dimension_numbers = #tpu.dot_dimension_numbers<[1], [0], [0], [1], [0, 0, 1, 1], [], []>} : vector<8x10xf32>, vector<10x32xf32>, vector<8x32xf32> -> vector<8x32xf32>
    %308 = arith.addf %304, %307 : vector<8x32xf32>
    %c0_85 = arith.constant 0 : index
    %c0_86 = arith.constant 0 : index
    %309 = vector.load %arg12[%c0_85, %c0_86] : memref<1x32xf32, #tpu.memory_space<vmem>>, vector<1x32xf32>
    %310 = vector.broadcast %309 : vector<1x32xf32> to vector<8x32xf32>
    %311 = arith.addf %308, %310 : vector<8x32xf32>
    %c0_87 = arith.constant 0 : index
    %c0_88 = arith.constant 0 : index
    %312 = vector.load %arg13[%c0_87, %c0_88] : memref<8x32xf32, #tpu.memory_space<vmem>>, vector<8x32xf32>
    tpu.vector_store %arg13[%c0_87, %c0_88], %311 {strides = array<i32>} : memref<8x32xf32, #tpu.memory_space<vmem>>, vector<8x32xf32>,
    return
  }
}

</mosaic_0001>

<bundles_post_ra>
// kernel: _forward_core.1
= control target key start
LH: loop header
LB: loop body
LE: loop exit
PB: predicated region body
PF: predicated region fallthrough
CT: control target
= control target key end

     0   :  { %18 = vsyncpa [#allocation3], 0  ;;  %s3460_s0 = inlined_call_operand.hbm [shape: f32[64,776], index: 0, kind: input, shape index: {}]   ;;  %s3461_s1 = inlined_call_operand.vmem [shape: f32[64,64], index: 1, kind: input, shape index: {}]   ;;  %s3462_s2 = inlined_call_operand.hbm [shape: f32[776,256], index: 2, kind: input, shape index: {}]   ;;  %s3463_s3 = inlined_call_operand.vmem [shape: f32[1,256], index: 3, kind: input, shape index: {}]   ;;  %s3464_s4 = inlined_call_operand.hbm [shape: f32[64,256], index: 4, kind: input, shape index: {}]   ;;  %s3465_s5 = inlined_call_operand.vmem [shape: f32[1,256], index: 5, kind: input, shape index: {}]   ;;  %s3466_s6 = inlined_call_operand.hbm [shape: f32[1,256], index: 6, kind: input, shape index: {}]   ;;  %s3467_s7 = inlined_call_operand.hbm [shape: f32[8,10], index: 7, kind: input, shape index: {}]   ;;  %s3468_s8 = inlined_call_operand.hbm [shape: f32[8,10], index: 8, kind: input, shape index: {}]   ;;  %s3469_s9 = inlined_call_operand.vmem [shape: f32[10,32], index: 9, kind: input, shape index: {}]   ;;  %s3470_s10 = inlined_call_operand.vmem [shape: f32[64,32], index: 10, kind: input, shape index: {}]   ;;  %s3471_s11 = inlined_call_operand.vmem [shape: f32[10,32], index: 11, kind: input, shape index: {}]   ;;  %s3472_s12 = inlined_call_operand.vmem [shape: f32[1,32], index: 12, kind: input, shape index: {}]   ;;  %s3473_s13 = inlined_call_operand.hbm [shape: f32[8,32], index: 13, kind: output, shape index: {}]  }
   0x1   :  { %19 = vsyncpa [#allocation6], 0 }
   0x2   :  { %20 = vsyncpa [#allocation9], 0 }
   0x3   :  { %21 = vsyncpa [#allocation12], 0 }
   0x4   :  { %22 = vsyncpa [#allocation4], 0  ;;  %s2840_s25 = smov [#allocation5]   ;;  %s2676_s29 = scalar_lea.hbm %s3462_s2, 24832 }
   0x5   :  { %s42_s26 = sshll.u32 %s2840_s25, 4  ;;  %p2677_p0 = scmp.ne.s32.totalorder %s3462_s2, %s2676_s29  ;;  %s43_s26 = int_to_ptr.vmem [resolvable:$true] %s42_s26 }
   0x6   :  { %p2680_p1 = scmp.lt.u32.totalorder %s2676_s29, %s3462_s2 }
   0x8   :  { %p2682_p2 = pnand %p2680_p1, %p2677_p0 }
   0xa   :  { %2685 = shalt.err (!%p2682_p2)
}
   0xb   :  { %s2686_s17 = scalar_lea.vmem %s43_s26, 24832  ;;  %p2691_p4 = scmp.lt.s32.totalorder %s43_s26, %s43_s26 }
   0xc   :  { %p2687_p3 = scmp.ne.s32.totalorder %s43_s26, %s2686_s17  ;;  %p2692_p5 = scmp.lt.s32.totalorder %s2686_s17, %s2686_s17 }
   0xe   :  { %p2693_p6 = por %p2692_p5, %p2691_p4 }
  0x10   :  { %p2694_p7 = pnand %p2693_p6, %p2687_p3 }
  0x12   :  { %2697 = shalt.err (!%p2694_p7)
}
  0x13   :  { %s2841_s18 = smov 256   ;;  %s2842_s19 = smov 16  }
  0x14   :  { %48 = dma.hbm_to_vmem [thread:$0]  %s3462_s2, 24832, %s43_s26, [#allocation6], %s2841_s18, %s2841_s18, %s2842_s19  }
  0x15   :  { %s2843_s22 = smov [#allocation8]   ;;  %s2844_s24 = smov [#allocation2]  }
  0x16   :  { %s71_s23 = sshll.u32 %s2843_s22, 4  ;;  %s28_s25 = sshll.u32 %s2844_s24, 4  ;;  %s72_s23 = int_to_ptr.vmem [resolvable:$true] %s71_s23  ;;  %s29_s25 = int_to_ptr.vmem [resolvable:$true] %s28_s25 }
  0x17   :  { %s2698_s29 = scalar_lea.hbm %s3466_s6, 32 }
  0x18   :  { %p2699_p8 = scmp.ne.s32.totalorder %s3466_s6, %s2698_s29  ;;  %p2702_p9 = scmp.lt.u32.totalorder %s2698_s29, %s3466_s6 }
  0x1a   :  { %p2704_p10 = pnand %p2702_p9, %p2699_p8 }
  0x1c   :  { %2707 = shalt.err (!%p2704_p10)
}
  0x1d   :  { %s2708_s2 = scalar_lea.vmem %s72_s23, 32  ;;  %p2713_p12 = scmp.lt.s32.totalorder %s72_s23, %s72_s23 }
  0x1e   :  { %p2709_p11 = scmp.ne.s32.totalorder %s72_s23, %s2708_s2  ;;  %p2714_p13 = scmp.lt.s32.totalorder %s2708_s2, %s2708_s2 }
  0x20   :  { %p2715_p0 = por %p2714_p13, %p2713_p12 }
  0x22   :  { %p2716_p1 = pnand %p2715_p0, %p2709_p11 }
  0x24   :  { %2719 = shalt.err (!%p2716_p1)
}
  0x25   :  { %74 = dma.hbm_to_vmem [thread:$0]  %s3466_s6, 32, %s72_s23, [#allocation9]  }
  0x26   :  { %s2720_s22 = scalar_lea.hbm %s3460_s0, 7168 }
  0x27   :  { %p2721_p2 = scmp.ne.s32.totalorder %s3460_s0, %s2720_s22  ;;  %p2724_p3 = scmp.lt.u32.totalorder %s2720_s22, %s3460_s0 }
  0x29   :  { %p2726_p4 = pnand %p2724_p3, %p2721_p2 }
  0x2b   :  { %2729 = shalt.err (!%p2726_p4)
}
  0x2c   :  { %s2730_s30 = scalar_lea.vmem %s29_s25, 7168  ;;  %p2735_p6 = scmp.lt.s32.totalorder %s29_s25, %s29_s25 }
  0x2d   :  { %p2731_p5 = scmp.ne.s32.totalorder %s29_s25, %s2730_s30  ;;  %p2736_p7 = scmp.lt.s32.totalorder %s2730_s30, %s2730_s30 }
  0x2f   :  { %p2737_p8 = por %p2736_p7, %p2735_p6 }
  0x31   :  { %p2738_p9 = pnand %p2737_p8, %p2731_p5 }
  0x33   :  { %2741 = shalt.err (!%p2738_p9)
}
  0x34   :  { %s2845_s6 = smov 896   ;;  %s2846_s23 = smov 56  }
  0x35   :  { %34 = dma.hbm_to_vmem [thread:$0]  %s3460_s0, 7168, %s29_s25, [#allocation3], %s2845_s6, %s2845_s6, %s2846_s23  }
  0x36   :  { %s2847_s16 = smov [#allocation7]   ;;  %s2848_s26 = smov [#allocation10]  }
  0x37   :  { %s56_s2 = sshll.u32 %s2847_s16, 4  ;;  %s81_s17 = sshll.u32 %s2848_s26, 4  ;;  %s57_s2 = int_to_ptr.vmem [resolvable:$true] %s56_s2  ;;  %s82_s17 = int_to_ptr.vmem [resolvable:$true] %s81_s17 }
  0x38   :  { %s2742_s22 = scalar_lea.hbm %s3464_s4, 2048 }
  0x39   :  { %p2743_p10 = scmp.ne.s32.totalorder %s3464_s4, %s2742_s22  ;;  %p2746_p11 = scmp.lt.u32.totalorder %s2742_s22, %s3464_s4 }
  0x3b   :  { %p2748_p12 = pnand %p2746_p11, %p2743_p10 }
  0x3d   :  { %2751 = shalt.err (!%p2748_p12)
}
  0x3e   :  { %s2752_s0 = scalar_lea.vmem %s57_s2, 2048  ;;  %p2757_p0 = scmp.lt.s32.totalorder %s57_s2, %s57_s2 }
  0x3f   :  { %p2753_p13 = scmp.ne.s32.totalorder %s57_s2, %s2752_s0  ;;  %p2758_p1 = scmp.lt.s32.totalorder %s2752_s0, %s2752_s0 }
  0x41   :  { %p2759_p2 = por %p2758_p1, %p2757_p0 }
  0x43   :  { %p2760_p3 = pnand %p2759_p2, %p2753_p13 }
  0x45   :  { %2763 = shalt.err (!%p2760_p3)
}
  0x46   :  { %62 = dma.hbm_to_vmem [thread:$0]  %s3464_s4, 2048, %s57_s2, [#allocation6], %s2841_s18, %s2841_s18, %s2842_s19  }
  0x47   :  { %s2764_s14 = scalar_lea.hbm %s3467_s7, 128 }
  0x48   :  { %p2765_p4 = scmp.ne.s32.totalorder %s3467_s7, %s2764_s14  ;;  %p2768_p5 = scmp.lt.u32.totalorder %s2764_s14, %s3467_s7 }
  0x4a   :  { %p2770_p6 = pnand %p2768_p5, %p2765_p4 }
  0x4c   :  { %2773 = shalt.err (!%p2770_p6)
}
  0x4d   :  { %s2774_s21 = scalar_lea.vmem %s82_s17, 128  ;;  %p2779_p8 = scmp.lt.s32.totalorder %s82_s17, %s82_s17 }
  0x4e   :  { %p2775_p7 = scmp.ne.s32.totalorder %s82_s17, %s2774_s21  ;;  %p2780_p9 = scmp.lt.s32.totalorder %s2774_s21, %s2774_s21 }
  0x50   :  { %p2781_p10 = por %p2780_p9, %p2779_p8 }
  0x52   :  { %p2782_p11 = pnand %p2781_p10, %p2775_p7 }
  0x54   :  { %2785 = shalt.err (!%p2782_p11)
}
  0x55   :  { %84 = dma.hbm_to_vmem [thread:$0]  %s3467_s7, 128, %s82_s17, [#allocation9]  }
  0x56   :  { %s2849_s19 = smov [#allocation11]   ;;  %s2786_s27 = scalar_lea.hbm %s3468_s8, 128 }
  0x57   :  { %s91_s2 = sshll.u32 %s2849_s19, 4  ;;  %p2787_p12 = scmp.ne.s32.totalorder %s3468_s8, %s2786_s27  ;;  %s92_s2 = int_to_ptr.vmem [resolvable:$true] %s91_s2 }
  0x58   :  { %p2790_p13 = scmp.lt.u32.totalorder %s2786_s27, %s3468_s8 }
  0x5a   :  { %p2792_p0 = pnand %p2790_p13, %p2787_p12 }
  0x5c   :  { %2795 = shalt.err (!%p2792_p0)
}
  0x5d   :  { %s2796_s30 = scalar_lea.vmem %s92_s2, 128  ;;  %p2801_p2 = scmp.lt.s32.totalorder %s92_s2, %s92_s2 }
  0x5e   :  { %p2797_p1 = scmp.ne.s32.totalorder %s92_s2, %s2796_s30  ;;  %p2802_p3 = scmp.lt.s32.totalorder %s2796_s30, %s2796_s30 }
  0x60   :  { %p2803_p4 = por %p2802_p3, %p2801_p2 }
  0x62   :  { %p2804_p5 = pnand %p2803_p4, %p2797_p1 }
  0x64   :  { %2807 = shalt.err (!%p2804_p5)
}
  0x65   :  { %94 = dma.hbm_to_vmem [thread:$0]  %s3468_s8, 128, %s92_s2, [#allocation12]  }
  0x66   :  { %2830 = dma.done.wait [#allocation3], 7168  }
  0x67   :  { %2831 = vsyncadd [#allocation3], 4294960128 }
  0x68   :  { %2832 = dma.done.wait [#allocation6], 26880  }
  0x69   :  { %2833 = vsyncadd [#allocation6], 4294940416 }
  0x6a   :  { %2834 = dma.done.wait [#allocation9], 160  }
  0x6b   :  { %2835 = vsyncadd [#allocation9], 4294967136 }
  0x6c   :  { %2836 = dma.done.wait [#allocation12], 128  }
  0x6d   :  { %2837 = vsyncadd [#allocation12], 4294967168  ;;  %v194_v0 = vld [vmem:[#allocation5 + $0x8] sm:$0xff]  ;;  %v196_v1 = vld [vmem:[#allocation5 + $0x18] sm:$0xff]  ;;  %vm399_vm0 = vcmask 64512   ;;  %vm942_vm1 = vcmask 523264  }
  0x6e   :  { %v193_v2 = vld [vmem:[#allocation5] sm:$0xff]  ;;  %v2208_v3 = vpack.c.bf16 %v196_v1, %v194_v0  ;;  %v195_v4 = vld [vmem:[#allocation5 + $0x10] sm:$0xff]  ;;  %v198_v5 = vld [vmem:[#allocation5 + $0x28] sm:$0xff]  ;;  %vm1884_vm2 = vcmask 1041408   ;;  %vm2853_vm3 = vmmov 1   ;;  %vm2854_vm5 = vmmov 0  }
  0x6f   :  { %v200_v6 = vld [vmem:[#allocation5 + $0x38] sm:$0xff]  ;;  %v2210_v7 = vpack.c.bf16 %v195_v4, %v193_v2  ;;  %v197_v9 = vld [vmem:[#allocation5 + $0x20] sm:$0xff]  ;;  %v199_v10 = vld [vmem:[#allocation5 + $0x30] sm:$0xff]  ;;  %vm1880_vm6 = vcmask 80896   ;;  %s2855_s28 = smov [#allocation13]   ;;  %vm2119_vm7 = vcmask 261120  }
  0x70   :  { %v2212_v8 = vpack.c.bf16 %v200_v6, %v198_v5  ;;  %v202_v11 = vld [vmem:[#allocation5 + $0x48] sm:$0xff]  ;;  %2209 = vmatprep.subr.bf16.mxu0 %v2208_v3  ;;  %v204_v12 = vld [vmem:[#allocation5 + $0x58] sm:$0xff]  ;;  %v2214_v13 = vpack.c.bf16 %v199_v10, %v197_v9  ;;  %v201_v15 = vld [vmem:[#allocation5 + $0x40] sm:$0xff]  ;;  %s2127_s29 = sshll.u32 %s2855_s28, 4  ;;  %s2128_s29 = int_to_ptr.vmem [resolvable:$true] %s2127_s29 }
  0x71   :  { %2211 = vmatpush1.bf16.msra.mxu0 %v2210_v7  ;;  %v2216_v14 = vpack.c.bf16 %v204_v12, %v202_v11  ;;  %v203_v16 = vld [vmem:[#allocation5 + $0x50] sm:$0xff]  ;;  %v206_v17 = vld [vmem:[#allocation5 + $0x68] sm:$0xff]  ;;  %v208_v18 = vld [vmem:[#allocation5 + $0x78] sm:$0xff]  ;;  %s2808_s0 = scalar_lea.vmem %s2128_s29, 128  ;;  %p2813_p7 = scmp.lt.s32.totalorder %s2128_s29, %s2128_s29 }
  0x72   :  { %2213 = vmatprep.subr.bf16.mxu0 %v2212_v8  ;;  %v2218_v19 = vpack.c.bf16 %v203_v16, %v201_v15  ;;  %v2220_v20 = vpack.c.bf16 %v208_v18, %v206_v17  ;;  %v205_v21 = vld [vmem:[#allocation5 + $0x60] sm:$0xff]  ;;  %v207_v22 = vld [vmem:[#allocation5 + $0x70] sm:$0xff]  ;;  %v210_v23 = vld [vmem:[#allocation5 + $0x88] sm:$0xff]  ;;  %p2809_p6 = scmp.ne.s32.totalorder %s2128_s29, %s2808_s0  ;;  %p2814_p8 = scmp.lt.s32.totalorder %s2808_s0, %s2808_s0 }
  0x73   :  { %v212_v24 = vld [vmem:[#allocation5 + $0x98] sm:$0xff]  ;;  %v2222_v25 = vpack.c.bf16 %v207_v22, %v205_v21  ;;  %v209_v27 = vld [vmem:[#allocation5 + $0x80] sm:$0xff]  ;;  %v211_v28 = vld [vmem:[#allocation5 + $0x90] sm:$0xff] }
  0x74   :  { %v2224_v26 = vpack.c.bf16 %v212_v24, %v210_v23  ;;  %v214_v29 = vld [vmem:[#allocation5 + $0xa8] sm:$0xff]  ;;  %v216_v30 = vld [vmem:[#allocation5 + $0xb8] sm:$0xff]  ;;  %v2226_v31 = vpack.c.bf16 %v211_v28, %v209_v27  ;;  %v213_v33 = vld [vmem:[#allocation5 + $0xa0] sm:$0xff]  ;;  %p2815_p9 = por %p2814_p8, %p2813_p7 }
  0x75   :  { %2215 = vmatpush1.bf16.msra.mxu0 %v2214_v13  ;;  %v2228_v32 = vpack.c.bf16 %v216_v30, %v214_v29  ;;  %v215_v34 = vld [vmem:[#allocation5 + $0xb0] sm:$0xff]  ;;  %v218_v35 = vld [vmem:[#allocation5 + $0xc8] sm:$0xff]  ;;  %v220_v36 = vld [vmem:[#allocation5 + $0xd8] sm:$0xff] }
  0x76   :  { %2217 = vmatprep.subr.bf16.mxu0 %v2216_v14  ;;  %v2230_v37 = vpack.c.bf16 %v215_v34, %v213_v33  ;;  %v2232_v38 = vpack.c.bf16 %v220_v36, %v218_v35  ;;  %v217_v39 = vld [vmem:[#allocation5 + $0xc0] sm:$0xff]  ;;  %v219_v40 = vld [vmem:[#allocation5 + $0xd0] sm:$0xff]  ;;  %v138_v41 = vld [vmem:[#allocation2 + $0x8] sm:$0xff]  ;;  %p2816_p10 = pnand %p2815_p9, %p2809_p6 }
  0x77   :  { %v222_v42 = vld [vmem:[#allocation5 + $0xe8] sm:$0xff]  ;;  %v224_v43 = vld [vmem:[#allocation5 + $0xf8] sm:$0xff]  ;;  %488 = vmatprep.mubr.f32.mxu0 %v138_v41  ;;  %v2234_v44 = vpack.c.bf16 %v219_v40, %v217_v39  ;;  %v221_v46 = vld [vmem:[#allocation5 + $0xe0] sm:$0xff] }
  0x78   :  { %v2236_v45 = vpack.c.bf16 %v224_v43, %v222_v42  ;;  %v223_v47 = vld [vmem:[#allocation5 + $0xf0] sm:$0xff]  ;;  %v226_v48 = vld [vmem:[#allocation5 + $0x108] sm:$0xff]  ;;  %v228_v49 = vld [vmem:[#allocation5 + $0x118] sm:$0xff] }
  0x79   :  { %2219 = vmatpush1.bf16.msra.mxu0 %v2218_v19  ;;  %v2238_v50 = vpack.c.bf16 %v223_v47, %v221_v46  ;;  %v2240_v51 = vpack.c.bf16 %v228_v49, %v226_v48  ;;  %v225_v52 = vld [vmem:[#allocation5 + $0x100] sm:$0xff]  ;;  %v227_v53 = vld [vmem:[#allocation5 + $0x110] sm:$0xff]  ;;  %v230_v54 = vld [vmem:[#allocation5 + $0x128] sm:$0xff]  ;;  %v2850_v48 = vmov 0.0  }
  0x7a   :  { %2221 = vmatprep.subr.bf16.mxu0 %v2220_v20  ;;  %v232_v55 = vld [vmem:[#allocation5 + $0x138] sm:$0xff]  ;;  %v2242_v56 = vpack.c.bf16 %v227_v53, %v225_v52  ;;  %v229_v58 = vld [vmem:[#allocation5 + $0x120] sm:$0xff]  ;;  %v231_v59 = vld [vmem:[#allocation5 + $0x130] sm:$0xff]  ;;  %827 = vmatprep.mubr.f32.mxu1 %v2850_v48 }
  0x7b   :  { %v2244_v57 = vpack.c.bf16 %v232_v55, %v230_v54  ;;  %v234_v60 = vld [vmem:[#allocation5 + $0x148] sm:$0xff]  ;;  %v236_v61 = vld [vmem:[#allocation5 + $0x158] sm:$0xff]  ;;  %v2246_v62 = vpack.c.bf16 %v231_v59, %v229_v58  ;;  %v233_v0 = vld [vmem:[#allocation5 + $0x140] sm:$0xff] }
  0x7c   :  { %v2248_v63 = vpack.c.bf16 %v236_v61, %v234_v60  ;;  %v235_v1 = vld [vmem:[#allocation5 + $0x150] sm:$0xff]  ;;  %v238_v2 = vld [vmem:[#allocation5 + $0x168] sm:$0xff]  ;;  %v240_v3 = vld [vmem:[#allocation5 + $0x178] sm:$0xff] }
  0x7d   :  { %2223 = vmatpush1.bf16.msra.mxu0 %v2222_v25  ;;  %v2250_v4 = vpack.c.bf16 %v235_v1, %v233_v0  ;;  %v2252_v5 = vpack.c.bf16 %v240_v3, %v238_v2  ;;  %v237_v6 = vld [vmem:[#allocation5 + $0x160] sm:$0xff]  ;;  %v239_v7 = vld [vmem:[#allocation5 + $0x170] sm:$0xff]  ;;  %v242_v8 = vld [vmem:[#allocation5 + $0x188] sm:$0xff] }
  0x7e   :  { %2225 = vmatprep.subr.bf16.mxu0 %v2224_v26  ;;  %v244_v9 = vld [vmem:[#allocation5 + $0x198] sm:$0xff]  ;;  %v2254_v10 = vpack.c.bf16 %v239_v7, %v237_v6  ;;  %v241_v12 = vld [vmem:[#allocation5 + $0x180] sm:$0xff]  ;;  %v243_v13 = vld [vmem:[#allocation5 + $0x190] sm:$0xff] }
  0x7f   :  { %v2256_v11 = vpack.c.bf16 %v244_v9, %v242_v8  ;;  %v246_v14 = vld [vmem:[#allocation5 + $0x1a8] sm:$0xff]  ;;  %v248_v15 = vld [vmem:[#allocation5 + $0x1b8] sm:$0xff]  ;;  %v2258_v16 = vpack.c.bf16 %v243_v13, %v241_v12  ;;  %v245_v18 = vld [vmem:[#allocation5 + $0x1a0] sm:$0xff] }
  0x80   :  { %v2260_v17 = vpack.c.bf16 %v248_v15, %v246_v14  ;;  %v247_v19 = vld [vmem:[#allocation5 + $0x1b0] sm:$0xff]  ;;  %v250_v20 = vld [vmem:[#allocation5 + $0x1c8] sm:$0xff]  ;;  %v252_v21 = vld [vmem:[#allocation5 + $0x1d8] sm:$0xff] }
  0x81   :  { %2227 = vmatpush1.bf16.msra.mxu0 %v2226_v31  ;;  %v2262_v22 = vpack.c.bf16 %v247_v19, %v245_v18  ;;  %v2264_v23 = vpack.c.bf16 %v252_v21, %v250_v20  ;;  %v249_v24 = vld [vmem:[#allocation5 + $0x1c0] sm:$0xff]  ;;  %v251_v25 = vld [vmem:[#allocation5 + $0x1d0] sm:$0xff]  ;;  %v254_v26 = vld [vmem:[#allocation5 + $0x1e8] sm:$0xff] }
  0x82   :  { %2229 = vmatprep.subr.bf16.mxu0 %v2228_v32  ;;  %v256_v27 = vld [vmem:[#allocation5 + $0x1f8] sm:$0xff]  ;;  %v2266_v28 = vpack.c.bf16 %v251_v25, %v249_v24  ;;  %v253_v30 = vld [vmem:[#allocation5 + $0x1e0] sm:$0xff]  ;;  %v255_v31 = vld [vmem:[#allocation5 + $0x1f0] sm:$0xff] }
  0x83   :  { %v2268_v29 = vpack.c.bf16 %v256_v27, %v254_v26  ;;  %v258_v32 = vld [vmem:[#allocation5 + $0x208] sm:$0xff]  ;;  %v260_v33 = vld [vmem:[#allocation5 + $0x218] sm:$0xff]  ;;  %v2270_v34 = vpack.c.bf16 %v255_v31, %v253_v30  ;;  %v257_v36 = vld [vmem:[#allocation5 + $0x200] sm:$0xff] }
  0x84   :  { %v2272_v35 = vpack.c.bf16 %v260_v33, %v258_v32  ;;  %v264_v39 = vld [vmem:[#allocation5 + $0x238] sm:$0xff]  ;;  %v137_v40 = vld [vmem:[#allocation2] sm:$0xff]  ;;  %v266_v46 = vld [vmem:[#allocation5 + $0x248] sm:$0xff] }
  0x85   :  { %2231 = vmatpush1.bf16.msra.mxu0 %v2230_v37  ;;  %v259_v37 = vld [vmem:[#allocation5 + $0x210] sm:$0xff]  ;;  %v261_v43 = vld [vmem:[#allocation5 + $0x220] sm:$0xff]  ;;  %v268_v47 = vld [vmem:[#allocation5 + $0x258] sm:$0xff] }
  0x86   :  { %2233 = vmatprep.subr.bf16.mxu0 %v2232_v38  ;;  %v262_v38 = vld [vmem:[#allocation5 + $0x228] sm:$0xff]  ;;  %v2274_v41 = vpack.c.bf16 %v259_v37, %v257_v36  ;;  %v265_v52 = vld [vmem:[#allocation5 + $0x240] sm:$0xff]  ;;  %v267_v53 = vld [vmem:[#allocation5 + $0x250] sm:$0xff] }
  0x87   :  { %v2276_v42 = vpack.c.bf16 %v264_v39, %v262_v38  ;;  %v152_v54 = vld [vmem:[#allocation2 + $0x78] sm:$0xff]  ;;  %v270_v55 = vld [vmem:[#allocation5 + $0x268] sm:$0xff]  ;;  %v151_v58 = vld [vmem:[#allocation2 + $0x70] sm:$0xff] }
  0x88   :  { %v269_v60 = vld [vmem:[#allocation5 + $0x260] sm:$0xff]  ;;  %v271_v61 = vld [vmem:[#allocation5 + $0x270] sm:$0xff]  ;;  %v276_v0 = vld [vmem:[#allocation5 + $0x298] sm:$0xff] }
  0x89   :  { %2235 = vmatpush1.bf16.msra.mxu0 %v2234_v44  ;;  %v263_v44 = vld [vmem:[#allocation5 + $0x230] sm:$0xff]  ;;  %v273_v1 = vld [vmem:[#allocation5 + $0x280] sm:$0xff]  ;;  %v386_v3 = vld [vmem:[#allocation5 + $0x608] sm:$0xff] }
  0x8a   :  { %2237 = vmatprep.subr.bf16.mxu0 %v2236_v45  ;;  %v145_v45 = vld [vmem:[#allocation2 + $0x40] sm:$0xff]  ;;  %v2278_v49 = vpack.c.bf16 %v263_v44, %v261_v43  ;;  %v275_v2 = vld [vmem:[#allocation5 + $0x290] sm:$0xff]  ;;  %v158_v6 = vld [vmem:[#allocation2 + $0xa8] sm:$0xff]  ;;  %763 = vmatprep.subr.mxu1 %v386_v3 }
  0x8b   :  { %v143_v7 = vld [vmem:[#allocation2 + $0x30] sm:$0xff]  ;;  %v122_v8 = vld [vmem:[#allocation7 + $0x8] sm:$0xff]  ;;  %v278_v13 = vld [vmem:[#allocation5 + $0x2a8] sm:$0xff]  ;;  %v2290_v19 = vpack.c.bf16 %v275_v2, %v273_v1 }
  0x8c   :  { %v121_v12 = vld [vmem:[#allocation7] sm:$0xff]  ;;  %v280_v14 = vld [vmem:[#allocation5 + $0x2b8] sm:$0xff]  ;;  %v150_v20 = vld [vmem:[#allocation2 + $0x68] sm:$0xff] }
  0x8d   :  { %2239 = vmatpush1.bf16.msra.mxu0 %v2238_v50  ;;  %v144_v50 = vld [vmem:[#allocation2 + $0x38] sm:$0xff]  ;;  %v277_v24 = vld [vmem:[#allocation5 + $0x2a0] sm:$0xff]  ;;  %v279_v25 = vld [vmem:[#allocation5 + $0x2b0] sm:$0xff] }
  0x8e   :  { %2241 = vmatprep.subr.bf16.mxu0 %v2240_v51  ;;  %v2280_v51 = vpack.c.bf16 %v268_v47, %v266_v46  ;;  %v126_v21 = vld [vmem:[#allocation7 + $0x28] sm:$0xff]  ;;  %v173_v26 = vld [vmem:[#allocation2 + $0x120] sm:$0xff]  ;;  %v282_v27 = vld [vmem:[#allocation5 + $0x2c8] sm:$0xff]  ;;  %v2294_v32 = vpack.c.bf16 %v279_v25, %v277_v24 }
  0x8f   :  { %v125_v30 = vld [vmem:[#allocation7 + $0x20] sm:$0xff]  ;;  %v127_v31 = vld [vmem:[#allocation7 + $0x30] sm:$0xff]  ;;  %v172_v33 = vld [vmem:[#allocation2 + $0x118] sm:$0xff] }
  0x90   :  { %v281_v36 = vld [vmem:[#allocation5 + $0x2c0] sm:$0xff]  ;;  %v283_v37 = vld [vmem:[#allocation5 + $0x2d0] sm:$0xff]  ;;  %v180_v38 = vld [vmem:[#allocation2 + $0x158] sm:$0xff] }
  0x91   :  { %2243 = vmatpush1.bf16.msra.mxu0 %v2242_v56  ;;  %v272_v56 = vld [vmem:[#allocation5 + $0x278] sm:$0xff]  ;;  %v286_v39 = vld [vmem:[#allocation5 + $0x2e8] sm:$0xff]  ;;  %v2298_v44 = vpack.c.bf16 %v283_v37, %v281_v36  ;;  %v307_v36 = vld [vmem:[#allocation5 + $0x390] sm:$0xff] }
  0x92   :  { %2245 = vmatprep.subr.bf16.mxu0 %v2244_v57  ;;  %v2282_v57 = vpack.c.bf16 %v267_v53, %v265_v52  ;;  %v2284_v59 = vpack.c.bf16 %v272_v56, %v270_v55  ;;  %v132_v43 = vld [vmem:[#allocation7 + $0x58] sm:$0xff]  ;;  %v164_v46 = vld [vmem:[#allocation2 + $0xd8] sm:$0xff]  ;;  %v129_v56 = vld [vmem:[#allocation7 + $0x40] sm:$0xff] }
  0x93   :  { %v290_v52 = vld [vmem:[#allocation5 + $0x308] sm:$0xff]  ;;  %v292_v53 = vld [vmem:[#allocation5 + $0x318] sm:$0xff]  ;;  %vm3382_vm4 = vmpackc.low %vm1884_vm2, %vm2853_vm3 }
  0x94   :  { %v186_v55 = vld [vmem:[#allocation2 + $0x188] sm:$0xff]  ;;  %v140_v1 = vld [vmem:[#allocation2 + $0x18] sm:$0xff] }
  0x95   :  { %2247 = vmatpush1.bf16.msra.mxu0 %v2246_v62  ;;  %v159_v62 = vld [vmem:[#allocation2 + $0xb0] sm:$0xff]  ;;  %v294_v2 = vld [vmem:[#allocation5 + $0x328] sm:$0xff]  ;;  %v296_v3 = vld [vmem:[#allocation5 + $0x338] sm:$0xff] }
  0x96   :  { %2249 = vmatprep.subr.bf16.mxu0 %v2248_v63  ;;  %v274_v63 = vld [vmem:[#allocation5 + $0x288] sm:$0xff]  ;;  %v304_v24 = vld [vmem:[#allocation5 + $0x378] sm:$0xff] }
  0x97   :  { %v2288_v9 = vpack.c.bf16 %v276_v0, %v274_v63  ;;  %v289_v63 = vld [vmem:[#allocation5 + $0x300] sm:$0xff]  ;;  %v291_v0 = vld [vmem:[#allocation5 + $0x310] sm:$0xff]  ;;  %v310_v37 = vld [vmem:[#allocation5 + $0x3a8] sm:$0xff] }
  0x99   :  { %2251 = vmatpush1.bf16.msra.mxu0 %v2250_v4  ;;  %v385_v4 = vld [vmem:[#allocation5 + $0x600] sm:$0xff] }
  0x9a   :  { %2253 = vmatprep.subr.bf16.mxu0 %v2252_v5  ;;  %v2286_v5 = vpack.c.bf16 %v271_v61, %v269_v60  ;;  %764 = vmatpush1.msra.mxu1 %v385_v4  ;;  %v134_v60 = vld [vmem:[#allocation7 + $0x68] sm:$0xff]  ;;  %v136_v61 = vld [vmem:[#allocation7 + $0x78] sm:$0xff] }
  0x9b   :  { %2139 = vmatmul.mubr.msk.f32.vlgmr.msra.gmra.mrb[0].mxu1 %vm399_vm0, %v143_v7  ;;  %v135_v7 = vld [vmem:[#allocation7 + $0x70] sm:$0xff] }
  0x9c   :  { %833 = vmatprep.mubr.f32.mxu1 %v2850_v48 }
  0x9d   :  { %2255 = vmatpush1.bf16.msra.mxu0 %v2254_v10  ;;  %v166_v10 = vld [vmem:[#allocation2 + $0xe8] sm:$0xff] }
  0x9e   :  { %2257 = vmatprep.subr.bf16.mxu0 %v2256_v11  ;;  %v124_v11 = vld [vmem:[#allocation7 + $0x18] sm:$0xff] }
  0x9f   :  { %v3005_v15 = vpack.c.bf16 %v124_v11, %v122_v8  ;;  %2140 = vmatmul.mubr.msk.f32.gmra.mrb[2].mxu1 %vm399_vm0, %v150_v20  ;;  %v2306_v8 = vpack.c.bf16 %v291_v0, %v289_v63  ;;  %v293_v11 = vld [vmem:[#allocation5 + $0x320] sm:$0xff]  ;;  %v323_v63 = vld [vmem:[#allocation5 + $0x410] sm:$0xff]  ;;  %v326_v0 = vld [vmem:[#allocation5 + $0x428] sm:$0xff] }
  0xa0   :  { %839 = vmatprep.mubr.f32.mxu1 %v2850_v48 }
  0xa1   :  { %2259 = vmatpush1.bf16.msra.mxu0 %v2258_v16  ;;  %v123_v16 = vld [vmem:[#allocation7 + $0x10] sm:$0xff]  ;;  %2401 = vmatprep.subr.bf16.mxu1 %v3005_v15 }
  0xa2   :  { %2261 = vmatprep.subr.bf16.mxu0 %v2260_v17  ;;  %v165_v17 = vld [vmem:[#allocation2 + $0xe0] sm:$0xff]  ;;  %v3008_v18 = vpack.c.bf16 %v123_v16, %v121_v12  ;;  %v295_v12 = vld [vmem:[#allocation5 + $0x330] sm:$0xff] }
  0xa4   :  { %2403 = vmatpush1.bf16.msra.mxu1 %v3008_v18 }
  0xa5   :  { %2263 = vmatpush1.bf16.msra.mxu0 %v2262_v22  ;;  %v128_v22 = vld [vmem:[#allocation7 + $0x38] sm:$0xff] }
  0xa6   :  { %2265 = vmatprep.subr.bf16.mxu0 %v2264_v23  ;;  %v2292_v23 = vpack.c.bf16 %v280_v14, %v278_v13  ;;  %v298_v13 = vld [vmem:[#allocation5 + $0x348] sm:$0xff]  ;;  %v300_v14 = vld [vmem:[#allocation5 + $0x358] sm:$0xff] }
  0xa7   :  { %v2312_v20 = vpack.c.bf16 %v300_v14, %v298_v13  ;;  %v146_v13 = vld [vmem:[#allocation2 + $0x48] sm:$0xff] }
  0xa9   :  { %2267 = vmatpush1.bf16.msra.mxu0 %v2266_v28  ;;  %v284_v28 = vld [vmem:[#allocation5 + $0x2d8] sm:$0xff] }
  0xaa   :  { %2269 = vmatprep.subr.bf16.mxu0 %v2268_v29  ;;  %v3013_v29 = vpack.c.bf16 %v128_v22, %v126_v21  ;;  %v297_v21 = vld [vmem:[#allocation5 + $0x340] sm:$0xff]  ;;  %v299_v22 = vld [vmem:[#allocation5 + $0x350] sm:$0xff] }
  0xab   :  { %v2314_v25 = vpack.c.bf16 %v299_v22, %v297_v21  ;;  %v334_v21 = vld [vmem:[#allocation5 + $0x468] sm:$0xff]  ;;  %v336_v22 = vld [vmem:[#allocation5 + $0x478] sm:$0xff] }
  0xac   :  { %2405 = vmatprep.subr.bf16.mxu1 %v3013_v29 }
  0xad   :  { %2271 = vmatpush1.bf16.msra.mxu0 %v2270_v34  ;;  %v157_v34 = vld [vmem:[#allocation2 + $0xa0] sm:$0xff] }
  0xae   :  { %2273 = vmatprep.subr.bf16.mxu0 %v2272_v35  ;;  %v2296_v35 = vpack.c.bf16 %v284_v28, %v282_v27  ;;  %2141 = vmatmul.mubr.msk.f32.gmra.mrb[4].mxu1 %vm399_vm0, %v157_v34  ;;  %v301_v28 = vld [vmem:[#allocation5 + $0x360] sm:$0xff] }
  0xaf   :  { %845 = vmatprep.mubr.f32.mxu1 %v2850_v48 }
  0xb0   :  { %489 = vmatmul.mubr.f32.vlgmr.msra.gmra.mrb[0].mxu0 %v137_v40  ;;  %v288_v40 = vld [vmem:[#allocation5 + $0x2f8] sm:$0xff] }
  0xb1   :  { %2275 = vmatpush1.bf16.msra.mxu0 %v2274_v41  ;;  %494 = vmatprep.mubr.f32.mxu0 %v145_v45  ;;  %v3018_v41 = vpack.c.bf16 %v127_v31, %v125_v30  ;;  %v179_v45 = vld [vmem:[#allocation2 + $0x150] sm:$0xff]  ;;  %v2300_v47 = vpack.c.bf16 %v288_v40, %v286_v39  ;;  %v306_v31 = vld [vmem:[#allocation5 + $0x388] sm:$0xff] }
  0xb2   :  { %2277 = vmatprep.subr.bf16.mxu0 %v2276_v42  ;;  %v130_v42 = vld [vmem:[#allocation7 + $0x48] sm:$0xff]  ;;  %2142 = vmatmul.mubr.msk.f32.gmra.mrb[6].mxu1 %vm399_vm0, %v164_v46  ;;  %v303_v30 = vld [vmem:[#allocation5 + $0x370] sm:$0xff] }
  0xb3   :  { %2407 = vmatpush1.bf16.msra.mxu1 %v3018_v41  ;;  %851 = vmatprep.mubr.f32.mxu1 %v2850_v48 }
  0xb4   :  { %495 = vmatmul.mubr.f32.gmra.mrb[2].mxu0 %v144_v50  ;;  %v287_v50 = vld [vmem:[#allocation5 + $0x2f0] sm:$0xff] }
  0xb5   :  { %2279 = vmatpush1.bf16.msra.mxu0 %v2278_v49  ;;  %500 = vmatprep.mubr.f32.mxu0 %v152_v54  ;;  %v285_v49 = vld [vmem:[#allocation5 + $0x2e0] sm:$0xff]  ;;  %v3023_v54 = vpack.c.bf16 %v132_v43, %v130_v42  ;;  %v311_v43 = vld [vmem:[#allocation5 + $0x3b0] sm:$0xff] }
  0xb6   :  { %2281 = vmatprep.subr.bf16.mxu0 %v2280_v51  ;;  %v187_v51 = vld [vmem:[#allocation2 + $0x190] sm:$0xff]  ;;  %v309_v42 = vld [vmem:[#allocation5 + $0x3a0] sm:$0xff] }
  0xb7   :  { %2409 = vmatprep.subr.bf16.mxu1 %v3023_v54  ;;  %v2326_v46 = vpack.c.bf16 %v311_v43, %v309_v42  ;;  %v167_v42 = vld [vmem:[#allocation2 + $0xf0] sm:$0xff] }
  0xb8   :  { %501 = vmatmul.mubr.f32.gmra.mrb[4].mxu0 %v151_v58  ;;  %v2302_v58 = vpack.c.bf16 %v287_v50, %v285_v49  ;;  %v313_v49 = vld [vmem:[#allocation5 + $0x3c0] sm:$0xff]  ;;  %v315_v50 = vld [vmem:[#allocation5 + $0x3d0] sm:$0xff] }
  0xb9   :  { %2283 = vmatpush1.bf16.msra.mxu0 %v2282_v57  ;;  %506 = vmatprep.mubr.f32.mxu0 %v159_v62  ;;  %v131_v57 = vld [vmem:[#allocation7 + $0x50] sm:$0xff]  ;;  %v2304_v62 = vpack.c.bf16 %v292_v53, %v290_v52  ;;  %v320_v52 = vld [vmem:[#allocation5 + $0x3f8] sm:$0xff]  ;;  %v2330_v53 = vpack.c.bf16 %v315_v50, %v313_v49 }
  0xba   :  { %2285 = vmatprep.subr.bf16.mxu0 %v2284_v59  ;;  %v171_v59 = vld [vmem:[#allocation2 + $0x110] sm:$0xff]  ;;  %v3028_v4 = vpack.c.bf16 %v131_v57, %v129_v56  ;;  %v317_v56 = vld [vmem:[#allocation5 + $0x3e0] sm:$0xff]  ;;  %v348_v49 = vld [vmem:[#allocation5 + $0x4d8] sm:$0xff] }
  0xbb   :  { %2143 = vmatmul.mubr.msk.f32.gmra.mrb[8].mxu1 %vm399_vm0, %v171_v59  ;;  %v319_v57 = vld [vmem:[#allocation5 + $0x3f0] sm:$0xff]  ;;  %v324_v59 = vld [vmem:[#allocation5 + $0x418] sm:$0xff] }
  0xbc   :  { %507 = vmatmul.mubr.f32.gmra.mrb[6].mxu0 %v158_v6  ;;  %v133_v6 = vld [vmem:[#allocation7 + $0x60] sm:$0xff]  ;;  %857 = vmatprep.mubr.f32.mxu1 %v2850_v48 }
  0xbd   :  { %2287 = vmatpush1.bf16.msra.mxu0 %v2286_v5  ;;  %512 = vmatprep.mubr.f32.mxu0 %v166_v10  ;;  %v3031_v5 = vpack.c.bf16 %v136_v61, %v134_v60  ;;  %v2308_v10 = vpack.c.bf16 %v296_v3, %v294_v2  ;;  %v3035_v16 = vpack.c.bf16 %v135_v7, %v133_v6  ;;  %v139_v2 = vld [vmem:[#allocation2 + $0x10] sm:$0xff]  ;;  %v325_v7 = vld [vmem:[#allocation5 + $0x420] sm:$0xff] }
  0xbe   :  { %2289 = vmatprep.subr.bf16.mxu0 %v2288_v9  ;;  %v178_v9 = vld [vmem:[#allocation2 + $0x148] sm:$0xff]  ;;  %2411 = vmatpush1.bf16.msra.mxu1 %v3028_v4  ;;  %v2334_v60 = vpack.c.bf16 %v319_v57, %v317_v56 }
  0xbf   :  { %2144 = vmatmul.mubr.msk.f32.gmra.mrb[10].mxu1 %vm399_vm0, %v178_v9  ;;  %2413 = vmatprep.subr.bf16.mxu1 %v3031_v5  ;;  %v147_v9 = vld [vmem:[#allocation2 + $0x50] sm:$0xff]  ;;  %v182_v56 = vld [vmem:[#allocation2 + $0x168] sm:$0xff] }
  0xc0   :  { %513 = vmatmul.mubr.f32.gmra.mrb[8].mxu0 %v165_v17  ;;  %v2310_v17 = vpack.c.bf16 %v295_v12, %v293_v11  ;;  %863 = vmatprep.mubr.f32.mxu1 %v2850_v48  ;;  %v332_v11 = vld [vmem:[#allocation5 + $0x458] sm:$0xff]  ;;  %v350_v57 = vld [vmem:[#allocation5 + $0x4e8] sm:$0xff] }
  0xc1   :  { %2291 = vmatpush1.bf16.msra.mxu0 %v2290_v19  ;;  %518 = vmatprep.mubr.f32.mxu0 %v173_v26  ;;  %v185_v19 = vld [vmem:[#allocation2 + $0x180] sm:$0xff]  ;;  %v192_v26 = vld [vmem:[#allocation2 + $0x1b8] sm:$0xff] }
  0xc2   :  { %2293 = vmatprep.subr.bf16.mxu0 %v2292_v23  ;;  %v302_v23 = vld [vmem:[#allocation5 + $0x368] sm:$0xff]  ;;  %2415 = vmatpush1.bf16.msra.mxu1 %v3035_v16 }
  0xc3   :  { %2145 = vmatmul.mubr.msk.f32.gmra.mrb[12].mxu1 %vm399_vm0, %v185_v19  ;;  %2417 = vmatprep.subr.bf16.mxu1 %v3005_v15  ;;  %v2316_v27 = vpack.c.bf16 %v304_v24, %v302_v23  ;;  %v331_v19 = vld [vmem:[#allocation5 + $0x450] sm:$0xff]  ;;  %v153_v24 = vld [vmem:[#allocation2 + $0x80] sm:$0xff] }
  0xc4   :  { %519 = vmatmul.mubr.f32.gmra.mrb[10].mxu0 %v172_v33  ;;  %869 = vmatprep.mubr.f32.mxu1 %v2850_v48  ;;  %v2318_v33 = vpack.c.bf16 %v303_v30, %v301_v28  ;;  %v161_v28 = vld [vmem:[#allocation2 + $0xc0] sm:$0xff]  ;;  %v338_v30 = vld [vmem:[#allocation5 + $0x488] sm:$0xff] }
  0xc5   :  { %2295 = vmatpush1.bf16.msra.mxu0 %v2294_v32  ;;  %524 = vmatprep.mubr.f32.mxu0 %v180_v38  ;;  %v308_v32 = vld [vmem:[#allocation5 + $0x398] sm:$0xff] }
  0xc6   :  { %2297 = vmatprep.subr.bf16.mxu0 %v2296_v35  ;;  %v2320_v34 = vpack.c.bf16 %v308_v32, %v306_v31  ;;  %v305_v35 = vld [vmem:[#allocation5 + $0x380] sm:$0xff]  ;;  %v312_v38 = vld [vmem:[#allocation5 + $0x3b8] sm:$0xff] }
  0xc7   :  { %2146 = vmatmul.mubr.msk.f32.gmra.mrb[14].mxu1 %vm399_vm0, %v192_v26  ;;  %v2322_v39 = vpack.c.bf16 %v307_v36, %v305_v35  ;;  %v2324_v40 = vpack.c.bf16 %v312_v38, %v310_v37  ;;  %v333_v26 = vld [vmem:[#allocation5 + $0x460] sm:$0xff]  ;;  %v340_v31 = vld [vmem:[#allocation5 + $0x498] sm:$0xff]  ;;  %v339_v36 = vld [vmem:[#allocation5 + $0x490] sm:$0xff] }
  0xc8   :  { %525 = vmatmul.mubr.f32.gmra.mrb[12].mxu0 %v179_v45  ;;  %1010 = vmatprep.mubr.f32.mxu1 %v2850_v48  ;;  %v316_v45 = vld [vmem:[#allocation5 + $0x3d8] sm:$0xff]  ;;  %v337_v35 = vld [vmem:[#allocation5 + $0x480] sm:$0xff]  ;;  %v342_v38 = vld [vmem:[#allocation5 + $0x4a8] sm:$0xff] }
  0xc9   :  { %2299 = vmatpush1.bf16.msra.mxu0 %v2298_v44  ;;  %530 = vmatprep.mubr.f32.mxu0 %v187_v51  ;;  %v314_v44 = vld [vmem:[#allocation5 + $0x3c8] sm:$0xff]  ;;  %v168_v37 = vld [vmem:[#allocation2 + $0xf8] sm:$0xff] }
  0xca   :  { %2301 = vmatprep.subr.bf16.mxu0 %v2300_v47  ;;  %v2328_v47 = vpack.c.bf16 %v316_v45, %v314_v44  ;;  %v318_v51 = vld [vmem:[#allocation5 + $0x3e8] sm:$0xff]  ;;  %v341_v44 = vld [vmem:[#allocation5 + $0x4a0] sm:$0xff]  ;;  %v343_v45 = vld [vmem:[#allocation5 + $0x4b0] sm:$0xff] }
  0xcb   :  { %1011 = vmatmul.mubr.f32.vlgmr.msra.gmra.mrb[16].mxu1 %v2850_v48  ;;  %v2358_v50 = vpack.c.bf16 %v343_v45, %v341_v44  ;;  %v373_v44 = vld [vmem:[#allocation5 + $0x5a0] sm:$0xff]  ;;  %v375_v45 = vld [vmem:[#allocation5 + $0x5b0] sm:$0xff] }
  0xcc   :  { %531 = vmatmul.mubr.f32.gmra.mrb[14].mxu0 %v186_v55  ;;  %2419 = vmatpush1.bf16.msra.mxu1 %v3008_v18  ;;  %v2332_v55 = vpack.c.bf16 %v320_v52, %v318_v51  ;;  %v174_v51 = vld [vmem:[#allocation2 + $0x128] sm:$0xff] }
  0xcd   :  { %2303 = vmatpush1.bf16.msra.mxu0 %v2302_v58  ;;  %601 = vmatprep.mubr.f32.mxu0 %v140_v1  ;;  %v322_v58 = vld [vmem:[#allocation5 + $0x408] sm:$0xff]  ;;  %v328_v1 = vld [vmem:[#allocation5 + $0x438] sm:$0xff] }
  0xce   :  { %2305 = vmatprep.subr.bf16.mxu0 %v2304_v62  ;;  %2421 = vmatprep.subr.bf16.mxu1 %v3013_v29  ;;  %v2336_v61 = vpack.c.bf16 %v324_v59, %v322_v58  ;;  %v321_v62 = vld [vmem:[#allocation5 + $0x400] sm:$0xff]  ;;  %v2340_v6 = vpack.c.bf16 %v328_v1, %v326_v0  ;;  %v352_v58 = vld [vmem:[#allocation5 + $0x4f8] sm:$0xff]  ;;  %v354_v1 = vld [vmem:[#allocation5 + $0x508] sm:$0xff] }
  0xcf   :  { %1115 = vmatprep.mubr.f32.mxu1 %v2850_v48  ;;  %v2338_v3 = vpack.c.bf16 %v323_v63, %v321_v62  ;;  %v349_v62 = vld [vmem:[#allocation5 + $0x4e0] sm:$0xff]  ;;  %v351_v63 = vld [vmem:[#allocation5 + $0x4f0] sm:$0xff] }
  0xd0   :  { %2423 = vmatpush1.bf16.msra.mxu1 %v3018_v41  ;;  %v189_v0 = vld [vmem:[#allocation2 + $0x1a0] sm:$0xff] }
  0xd1   :  { %2307 = vmatpush1.bf16.msra.mxu0 %v2306_v8  ;;  %2425 = vmatprep.subr.bf16.mxu1 %v3023_v54  ;;  %v327_v8 = vld [vmem:[#allocation5 + $0x430] sm:$0xff] }
  0xd2   :  { %2309 = vmatprep.subr.bf16.mxu0 %v2308_v10  ;;  %v330_v10 = vld [vmem:[#allocation5 + $0x448] sm:$0xff]  ;;  %v2342_v12 = vpack.c.bf16 %v327_v8, %v325_v7  ;;  %v353_v8 = vld [vmem:[#allocation5 + $0x500] sm:$0xff] }
  0xd3   :  { %v2344_v14 = vpack.c.bf16 %v332_v11, %v330_v10  ;;  %v142_v10 = vld [vmem:[#allocation2 + $0x28] sm:$0xff] }
  0xd4   :  { %2427 = vmatpush1.bf16.msra.mxu1 %v3028_v4  ;;  %v358_v11 = vld [vmem:[#allocation5 + $0x528] sm:$0xff] }
  0xd5   :  { %2311 = vmatpush1.bf16.msra.mxu0 %v2310_v17  ;;  %2429 = vmatprep.subr.bf16.mxu1 %v3031_v5  ;;  %v329_v17 = vld [vmem:[#allocation5 + $0x440] sm:$0xff] }
  0xd6   :  { %2313 = vmatprep.subr.bf16.mxu0 %v2312_v20  ;;  %v154_v20 = vld [vmem:[#allocation2 + $0x88] sm:$0xff]  ;;  %v2346_v23 = vpack.c.bf16 %v331_v19, %v329_v17  ;;  %v357_v17 = vld [vmem:[#allocation5 + $0x520] sm:$0xff]  ;;  %v359_v19 = vld [vmem:[#allocation5 + $0x530] sm:$0xff] }
  0xd8   :  { %2431 = vmatpush1.bf16.msra.mxu1 %v3035_v16 }
  0xd9   :  { %2315 = vmatpush1.bf16.msra.mxu0 %v2314_v25  ;;  %2433 = vmatprep.subr.bf16.mxu1 %v3005_v15  ;;  %v2348_v25 = vpack.c.bf16 %v336_v22, %v334_v21  ;;  %v364_v21 = vld [vmem:[#allocation5 + $0x558] sm:$0xff]  ;;  %v2374_v22 = vpack.c.bf16 %v359_v19, %v357_v17 }
  0xda   :  { %2317 = vmatprep.subr.bf16.mxu0 %v2316_v27  ;;  %v335_v27 = vld [vmem:[#allocation5 + $0x470] sm:$0xff] }
  0xdb   :  { %v2350_v32 = vpack.c.bf16 %v335_v27, %v333_v26  ;;  %v366_v26 = vld [vmem:[#allocation5 + $0x568] sm:$0xff]  ;;  %v368_v27 = vld [vmem:[#allocation5 + $0x578] sm:$0xff] }
  0xdd   :  { %2319 = vmatpush1.bf16.msra.mxu0 %v2318_v33  ;;  %v160_v33 = vld [vmem:[#allocation2 + $0xb8] sm:$0xff] }
  0xde   :  { %2321 = vmatprep.subr.bf16.mxu0 %v2320_v34  ;;  %v2352_v34 = vpack.c.bf16 %v340_v31, %v338_v30  ;;  %v2380_v30 = vpack.c.bf16 %v368_v27, %v366_v26  ;;  %v365_v31 = vld [vmem:[#allocation5 + $0x560] sm:$0xff] }
  0xe1   :  { %2323 = vmatpush1.bf16.msra.mxu0 %v2322_v39  ;;  %v344_v39 = vld [vmem:[#allocation5 + $0x4b8] sm:$0xff] }
  0xe2   :  { %2325 = vmatprep.subr.bf16.mxu0 %v2324_v40  ;;  %v2354_v40 = vpack.c.bf16 %v339_v36, %v337_v35  ;;  %v2356_v43 = vpack.c.bf16 %v344_v39, %v342_v38  ;;  %v371_v38 = vld [vmem:[#allocation5 + $0x590] sm:$0xff]  ;;  %v374_v39 = vld [vmem:[#allocation5 + $0x5a8] sm:$0xff] }
  0xe5   :  { %2327 = vmatpush1.bf16.msra.mxu0 %v2326_v46  ;;  %v175_v46 = vld [vmem:[#allocation2 + $0x130] sm:$0xff] }
  0xe6   :  { %2329 = vmatprep.subr.bf16.mxu0 %v2328_v47  ;;  %v346_v47 = vld [vmem:[#allocation5 + $0x4c8] sm:$0xff] }
  0xe7   :  { %v2360_v52 = vpack.c.bf16 %v348_v49, %v346_v47  ;;  %v380_v47 = vld [vmem:[#allocation5 + $0x5d8] sm:$0xff]  ;;  %v2390_v49 = vpack.c.bf16 %v375_v45, %v373_v44  ;;  %v904_v44 = vld [vmem:[#allocation8] sm:$0x3] }
  0xe9   :  { %2331 = vmatpush1.bf16.msra.mxu0 %v2330_v53  ;;  %v345_v53 = vld [vmem:[#allocation5 + $0x4c0] sm:$0xff] }
  0xea   :  { %2333 = vmatprep.subr.bf16.mxu0 %v2332_v55  ;;  %v347_v55 = vld [vmem:[#allocation5 + $0x4d0] sm:$0xff] }
  0xeb   :  { %v2362_v59 = vpack.c.bf16 %v347_v55, %v345_v53  ;;  %v382_v53 = vld [vmem:[#allocation5 + $0x5e8] sm:$0xff]  ;;  %v384_v55 = vld [vmem:[#allocation5 + $0x5f8] sm:$0xff] }
  0xed   :  { %2335 = vmatpush1.bf16.msra.mxu0 %v2334_v60  ;;  %v181_v60 = vld [vmem:[#allocation2 + $0x160] sm:$0xff] }
  0xee   :  { %2337 = vmatprep.subr.bf16.mxu0 %v2336_v61  ;;  %v2364_v61 = vpack.c.bf16 %v352_v58, %v350_v57  ;;  %v2396_v57 = vpack.c.bf16 %v384_v55, %v382_v53  ;;  %v381_v58 = vld [vmem:[#allocation5 + $0x5e0] sm:$0xff] }
  0xef   :  { %v876_v53 = vld [vmem:[%s3465_s5] sm:$0x3]  ;;  %s2851_s5 = smov 64  }
  0xf0   :  { %602 = vmatmul.mubr.f32.vlgmr.msra.gmra.mrb[0].mxu0 %v139_v2  ;;  %v356_v2 = vld [vmem:[#allocation5 + $0x518] sm:$0xff] }
  0xf1   :  { %2339 = vmatpush1.bf16.msra.mxu0 %v2338_v3  ;;  %607 = vmatprep.mubr.f32.mxu0 %v147_v9  ;;  %v2366_v3 = vpack.c.bf16 %v351_v63, %v349_v62  ;;  %v2368_v7 = vpack.c.bf16 %v356_v2, %v354_v1  ;;  %v355_v9 = vld [vmem:[#allocation5 + $0x510] sm:$0xff]  ;;  %v149_v62 = vld [vmem:[#allocation2 + $0x60] sm:$0xff]  ;;  %v148_v63 = vld [vmem:[#allocation2 + $0x58] sm:$0xff] }
  0xf2   :  { %2341 = vmatprep.subr.bf16.mxu0 %v2340_v6  ;;  %v188_v6 = vld [vmem:[#allocation2 + $0x198] sm:$0xff]  ;;  %v155_v1 = vld [vmem:[#allocation2 + $0x90] sm:$0xff] }
  0xf3   :  { %v163_v2 = vld [vmem:[#allocation2 + $0xd0] sm:$0xff] }
  0xf4   :  { %608 = vmatmul.mubr.f32.gmra.mrb[2].mxu0 %v146_v13  ;;  %v2370_v13 = vpack.c.bf16 %v355_v9, %v353_v8  ;;  %v177_v8 = vld [vmem:[#allocation2 + $0x140] sm:$0xff]  ;;  %v176_v9 = vld [vmem:[#allocation2 + $0x138] sm:$0xff] }
  0xf5   :  { %2343 = vmatpush1.bf16.msra.mxu0 %v2342_v12  ;;  %613 = vmatprep.mubr.f32.mxu0 %v154_v20  ;;  %v360_v12 = vld [vmem:[#allocation5 + $0x538] sm:$0xff]  ;;  %v362_v20 = vld [vmem:[#allocation5 + $0x548] sm:$0xff] }
  0xf6   :  { %2345 = vmatprep.subr.bf16.mxu0 %v2344_v14  ;;  %v2372_v14 = vpack.c.bf16 %v360_v12, %v358_v11  ;;  %v183_v11 = vld [vmem:[#allocation2 + $0x170] sm:$0xff] }
  0xf7   :  { %v191_v12 = vld [vmem:[#allocation2 + $0x1b0] sm:$0xff] }
  0xf8   :  { %614 = vmatmul.mubr.f32.gmra.mrb[4].mxu0 %v153_v24  ;;  %v361_v24 = vld [vmem:[#allocation5 + $0x540] sm:$0xff] }
  0xf9   :  { %2347 = vmatpush1.bf16.msra.mxu0 %v2346_v23  ;;  %619 = vmatprep.mubr.f32.mxu0 %v161_v28  ;;  %v2376_v23 = vpack.c.bf16 %v364_v21, %v362_v20 }
  0xfa   :  { %2349 = vmatprep.subr.bf16.mxu0 %v2348_v25  ;;  %v363_v25 = vld [vmem:[#allocation5 + $0x550] sm:$0xff] }
  0xfb   :  { %v2378_v28 = vpack.c.bf16 %v363_v25, %v361_v24 }
  0xfc   :  { %620 = vmatmul.mubr.f32.gmra.mrb[6].mxu0 %v160_v33  ;;  %v370_v33 = vld [vmem:[#allocation5 + $0x588] sm:$0xff] }
  0xfd   :  { %2351 = vmatpush1.bf16.msra.mxu0 %v2350_v32  ;;  %625 = vmatprep.mubr.f32.mxu0 %v168_v37  ;;  %v367_v32 = vld [vmem:[#allocation5 + $0x570] sm:$0xff]  ;;  %v369_v37 = vld [vmem:[#allocation5 + $0x580] sm:$0xff] }
  0xfe   :  { %2353 = vmatprep.subr.bf16.mxu0 %v2352_v34  ;;  %v372_v34 = vld [vmem:[#allocation5 + $0x598] sm:$0xff]  ;;  %v2382_v35 = vpack.c.bf16 %v367_v32, %v365_v31 }
  0xff   :  { %v2384_v36 = vpack.c.bf16 %v372_v34, %v370_v33 }
 0x100   :  { %626 = vmatmul.mubr.f32.gmra.mrb[8].mxu0 %v167_v42  ;;  %v2386_v42 = vpack.c.bf16 %v371_v38, %v369_v37 }
 0x101   :  { %2355 = vmatpush1.bf16.msra.mxu0 %v2354_v40  ;;  %631 = vmatprep.mubr.f32.mxu0 %v175_v46  ;;  %v376_v40 = vld [vmem:[#allocation5 + $0x5b8] sm:$0xff]  ;;  %v378_v46 = vld [vmem:[#allocation5 + $0x5c8] sm:$0xff] }
 0x102   :  { %2357 = vmatprep.subr.bf16.mxu0 %v2356_v43  ;;  %v2388_v43 = vpack.c.bf16 %v376_v40, %v374_v39  ;;  %v387_v39 = vld [vmem:[%s3463_s3] sm:$0x3] }
 0x104   :  { %632 = vmatmul.mubr.f32.gmra.mrb[10].mxu0 %v174_v51  ;;  %v377_v51 = vld [vmem:[#allocation5 + $0x5c0] sm:$0xff] }
 0x105   :  { %2359 = vmatpush1.bf16.msra.mxu0 %v2358_v50  ;;  %637 = vmatprep.mubr.f32.mxu0 %v182_v56  ;;  %v2392_v50 = vpack.c.bf16 %v380_v47, %v378_v46 }
 0x106   :  { %2361 = vmatprep.subr.bf16.mxu0 %v2360_v52  ;;  %v379_v52 = vld [vmem:[#allocation5 + $0x5d0] sm:$0xff] }
 0x107   :  { %v2394_v56 = vpack.c.bf16 %v379_v52, %v377_v51 }
 0x108   :  { %638 = vmatmul.mubr.f32.gmra.mrb[12].mxu0 %v181_v60 }
 0x109   :  { %2363 = vmatpush1.bf16.msra.mxu0 %v2362_v59  ;;  %643 = vmatprep.mubr.f32.mxu0 %v189_v0  ;;  %v383_v59 = vld [vmem:[#allocation5 + $0x5f0] sm:$0xff]  ;;  %v156_v0 = vld [vmem:[#allocation2 + $0x98] sm:$0xff] }
 0x10a   :  { %2365 = vmatprep.subr.bf16.mxu0 %v2364_v61  ;;  %v2398_v60 = vpack.c.bf16 %v383_v59, %v381_v58  ;;  %v141_v61 = vld [vmem:[#allocation2 + $0x20] sm:$0xff] }
 0x10c   :  { %644 = vmatmul.mubr.f32.gmra.mrb[14].mxu0 %v188_v6  ;;  %v170_v6 = vld [vmem:[#allocation2 + $0x108] sm:$0xff] }
 0x10d   :  { %2367 = vmatpush1.bf16.msra.mxu0 %v2366_v3  ;;  %714 = vmatprep.mubr.f32.mxu0 %v142_v10  ;;  %v162_v3 = vld [vmem:[#allocation2 + $0xc8] sm:$0xff]  ;;  %v184_v10 = vld [vmem:[#allocation2 + $0x178] sm:$0xff] }
 0x10e   :  { %2369 = vmatprep.subr.bf16.mxu0 %v2368_v7  ;;  %v169_v7 = vld [vmem:[#allocation2 + $0x100] sm:$0xff] }
 0x111   :  { %2371 = vmatpush1.bf16.msra.mxu0 %v2370_v13  ;;  %v190_v13 = vld [vmem:[#allocation2 + $0x1a8] sm:$0xff] }
 0x112   :  { %2373 = vmatprep.subr.bf16.mxu0 %v2372_v14 }
 0x115   :  { %2375 = vmatpush1.bf16.msra.mxu0 %v2374_v22 }
 0x116   :  { %2377 = vmatprep.subr.bf16.mxu0 %v2376_v23 }
 0x119   :  { %2379 = vmatpush1.bf16.msra.mxu0 %v2378_v28 }
 0x11a   :  { %2381 = vmatprep.subr.bf16.mxu0 %v2380_v30 }
 0x11d   :  { %2383 = vmatpush1.bf16.msra.mxu0 %v2382_v35 }
 0x11e   :  { %2385 = vmatprep.subr.bf16.mxu0 %v2384_v36  ;;  %v389_v36 = vlaneseq }
 0x120   :  { %v390_v37 = vshrl.u32 %v389_v36, 7 }
 0x121   :  { %2387 = vmatpush1.bf16.msra.mxu0 %v2386_v42 }
 0x122   :  { %2389 = vmatprep.subr.bf16.mxu0 %v2388_v43  ;;  %v391_v38 = vsub.s32 0, %v390_v37  ;;  %v395_v40 = vsub.s32 1, %v390_v37 }
 0x124   :  { %v3079_v42 = vrot.slane %v387_v39, %v391_v38  ;;  %v3081_v43 = vrot.slane %v387_v39, %v395_v40  ;;  %v3087_v51 = vrot.slane %v904_v44, %v395_v40 }
 0x125   :  { %2391 = vmatpush1.bf16.msra.mxu0 %v2390_v49  ;;  %v3084_v49 = vrot.slane %v904_v44, %v391_v38 }
 0x126   :  { %2393 = vmatprep.subr.bf16.mxu0 %v2392_v50 }
 0x129   :  { %2395 = vmatpush1.bf16.msra.mxu0 %v2394_v56 }
 0x12a   :  { %2397 = vmatprep.subr.bf16.mxu0 %v2396_v57 }
 0x12d   :  { %2399 = vmatpush1.bf16.msra.mxu0 %v2398_v60 }
 0x130   :  { %715 = vmatmul.mubr.f32.vlgmr.msra.gmra.mrb[0].mxu0 %v141_v61 }
 0x131   :  { %720 = vmatprep.mubr.f32.mxu0 %v149_v62  ;;  %v3106_v62 = vrot.slane %v876_v53, %v391_v38 }
 0x134   :  { %721 = vmatmul.mubr.f32.gmra.mrb[2].mxu0 %v148_v63 }
 0x135   :  { %726 = vmatprep.mubr.f32.mxu0 %v156_v0  ;;  %v3108_v0 = vrot.slane %v876_v53, %v395_v40 }
 0x138   :  { %727 = vmatmul.mubr.f32.gmra.mrb[4].mxu0 %v155_v1 }
 0x139   :  { %732 = vmatprep.mubr.f32.mxu0 %v163_v2 }
 0x13c   :  { %733 = vmatmul.mubr.f32.gmra.mrb[6].mxu0 %v162_v3 }
 0x13d   :  { %738 = vmatprep.mubr.f32.mxu0 %v170_v6 }
 0x140   :  { %739 = vmatmul.mubr.f32.gmra.mrb[8].mxu0 %v169_v7 }
 0x141   :  { %744 = vmatprep.mubr.f32.mxu0 %v177_v8 }
 0x144   :  { %745 = vmatmul.mubr.f32.gmra.mrb[10].mxu0 %v176_v9 }
 0x145   :  { %750 = vmatprep.mubr.f32.mxu0 %v184_v10 }
 0x148   :  { %751 = vmatmul.mubr.f32.gmra.mrb[12].mxu0 %v183_v11 }
 0x149   :  { %756 = vmatprep.mubr.f32.mxu0 %v191_v12 }
 0x14c   :  { %757 = vmatmul.mubr.f32.gmra.mrb[14].mxu0 %v190_v13 }
 0x16e   :  { %v829_v14 = vpop.f32.mrb[0].mxu1 }
 0x16f   :  { %v831_v17 = vpop.f32.mrb[1].mxu1 }
 0x172   :  { %v835_v19 = vpop.f32.mrb[2].mxu1 }
 0x173   :  { %v837_v20 = vpop.f32.mrb[3].mxu1 }
 0x181   :  { %v841_v21 = vpop.f32.mrb[4].mxu1 }
 0x182   :  { %v843_v22 = vpop.f32.mrb[5].mxu1 }
 0x185   :  { %v847_v23 = vpop.f32.mrb[6].mxu1 }
 0x186   :  { %v849_v24 = vpop.f32.mrb[7].mxu1 }
 0x18e   :  { %v3056_v25 = vpop.f32.mrb[8].mxu1 }
 0x18f   :  { %v3058_v26 = vpop.f32.mrb[9].mxu1 }
 0x192   :  { %v3060_v27 = vpop.f32.mrb[10].mxu1 }
 0x193   :  { %v3062_v28 = vpop.f32.mrb[11].mxu1 }
 0x196   :  { %v3064_v30 = vpop.f32.mrb[12].mxu1 }
 0x197   :  { %v3066_v31 = vpop.f32.mrb[13].mxu1 }
 0x19a   :  { %v3068_v32 = vpop.f32.mrb[14].mxu1 }
 0x19b   :  { %v3070_v33 = vpop.f32.mrb[15].mxu1 }
 0x19e   :  { %v3072_v34 = vpop.f32.mrb[16].mxu1 }
 0x19f   :  { %v3074_v35 = vpop.f32.mrb[17].mxu1 }
 0x203   :  { %v716_v45 = vpop.f32.mrb[0].mxu0 }
 0x204   :  { %v2548_v46 = vadd.f32 %v716_v45, %v3079_v42  ;;  %v718_v47 = vpop.f32.mrb[1].mxu0 }
 0x205   :  { %v2550_v50 = vadd.f32 %v718_v47, %v3081_v43 }
 0x206   :  { %v3089_v52 = vadd.f32 %v2548_v46, %v829_v14 }
 0x207   :  { %v3094_v55 = vadd.f32 %v2550_v50, %v831_v17  ;;  %v722_v56 = vpop.f32.mrb[2].mxu0 }
 0x208   :  { %v3098_v57 = vmul.f32 %v3089_v52, %v3084_v49  ;;  %v2552_v58 = vadd.f32 %v722_v56, %v3079_v42  ;;  %v724_v59 = vpop.f32.mrb[3].mxu0 }
 0x209   :  { %v3103_v60 = vmul.f32 %v3094_v55, %v3087_v51  ;;  %v2554_v61 = vadd.f32 %v724_v59, %v3081_v43 }
 0x20a   :  { %v2553_v63 = vadd.f32 %v2552_v58, %v835_v19 }
 0x20b   :  { %v2555_v1 = vadd.f32 %v2554_v61, %v837_v20  ;;  %v728_v2 = vpop.f32.mrb[4].mxu0 }
 0x20c   :  { %v3111_v3 = vmul.f32 %v2553_v63, %v3106_v62  ;;  %v3114_v6 = vmul.f32 %v2553_v63, %v3084_v49  ;;  %v2556_v7 = vadd.f32 %v728_v2, %v3079_v42  ;;  %v730_v8 = vpop.f32.mrb[5].mxu0 }
 0x20d   :  { %v3118_v9 = vmul.f32 %v2555_v1, %v3108_v0  ;;  %v3121_v10 = vmul.f32 %v2555_v1, %v3087_v51  ;;  %v2558_v11 = vadd.f32 %v730_v8, %v3081_v43 }
 0x20e   :  { %v2557_v12 = vadd.f32 %v2556_v7, %v841_v21 }
 0x20f   :  { %v2559_v13 = vadd.f32 %v2558_v11, %v843_v22  ;;  %v734_v14 = vpop.f32.mrb[6].mxu0 }
 0x210   :  { %v892_v17 = vmul.f32 %v2557_v12, %v3106_v62  ;;  %v920_v19 = vmul.f32 %v2557_v12, %v3084_v49  ;;  %v2560_v20 = vadd.f32 %v734_v14, %v3079_v42  ;;  %v736_v36 = vpop.f32.mrb[7].mxu0 }
 0x211   :  { %v893_v37 = vmul.f32 %v2559_v13, %v3108_v0  ;;  %v921_v38 = vmul.f32 %v2559_v13, %v3087_v51  ;;  %v2562_v39 = vadd.f32 %v736_v36, %v3081_v43 }
 0x212   :  { %v2561_v40 = vadd.f32 %v2560_v20, %v847_v23 }
 0x213   :  { %v2563_v44 = vadd.f32 %v2562_v39, %v849_v24  ;;  %v740_v45 = vpop.f32.mrb[8].mxu0 }
 0x214   :  { %v894_v21 = vmul.f32 %v2561_v40, %v3106_v62  ;;  %v922_v22 = vmul.f32 %v2561_v40, %v3084_v49  ;;  %v2564_v46 = vadd.f32 %v740_v45, %v3079_v42  ;;  %v742_v47 = vpop.f32.mrb[9].mxu0 }
 0x215   :  { %v895_v50 = vmul.f32 %v2563_v44, %v3108_v0  ;;  %v923_v53 = vmul.f32 %v2563_v44, %v3087_v51  ;;  %v2566_v56 = vadd.f32 %v742_v47, %v3081_v43 }
 0x216   :  { %v2565_v58 = vadd.f32 %v2564_v46, %v3056_v25 }
 0x217   :  { %v2567_v59 = vadd.f32 %v2566_v56, %v3058_v26  ;;  %v746_v23 = vpop.f32.mrb[10].mxu0 }
 0x218   :  { %v896_v24 = vmul.f32 %v2565_v58, %v3106_v62  ;;  %v924_v61 = vmul.f32 %v2565_v58, %v3084_v49  ;;  %v2568_v63 = vadd.f32 %v746_v23, %v3079_v42  ;;  %v748_v1 = vpop.f32.mrb[11].mxu0 }
 0x219   :  { %v897_v2 = vmul.f32 %v2567_v59, %v3108_v0  ;;  %v925_v7 = vmul.f32 %v2567_v59, %v3087_v51  ;;  %v2570_v8 = vadd.f32 %v748_v1, %v3081_v43  ;;  %v888_v1 = vmul.f32 %v3089_v52, %v3106_v62 }
 0x21a   :  { %v2569_v11 = vadd.f32 %v2568_v63, %v3060_v27  ;;  %v3145_v12 = vadd.f32 %v924_v61, %v894_v21  ;;  %v3147_v25 = vadd.f32 %v922_v22, %v896_v24 }
 0x21b   :  { %v2571_v26 = vadd.f32 %v2570_v8, %v3062_v28  ;;  %v752_v13 = vpop.f32.mrb[12].mxu0  ;;  %v3150_v14 = vadd.f32 %v925_v7, %v895_v50  ;;  %v3152_v20 = vadd.f32 %v923_v53, %v897_v2 }
 0x21c   :  { %v898_v36 = vmul.f32 %v2569_v11, %v3106_v62  ;;  %v926_v39 = vmul.f32 %v2569_v11, %v3084_v49  ;;  %v2572_v40 = vadd.f32 %v752_v13, %v3079_v42  ;;  %v754_v44 = vpop.f32.mrb[13].mxu0 }
 0x21d   :  { %v899_v27 = vmul.f32 %v2571_v26, %v3108_v0  ;;  %v927_v45 = vmul.f32 %v2571_v26, %v3087_v51  ;;  %v2574_v21 = vadd.f32 %v754_v44, %v3081_v43 }
 0x21e   :  { %v2573_v28 = vadd.f32 %v2572_v40, %v3064_v30  ;;  %v3161_v22 = vadd.f32 %v926_v39, %v892_v17  ;;  %v3163_v46 = vadd.f32 %v920_v19, %v898_v36  ;;  %v932_v36 = vld [vmem:[%s3461_s1] sm:$0xff] }
 0x21f   :  { %v2575_v47 = vadd.f32 %v2574_v21, %v3066_v31  ;;  %v758_v50 = vpop.f32.mrb[14].mxu0  ;;  %v3166_v53 = vadd.f32 %v927_v45, %v893_v37  ;;  %v3168_v56 = vadd.f32 %v921_v38, %v899_v27 }
 0x220   :  { %v900_v58 = vmul.f32 %v2573_v28, %v3106_v62  ;;  %v928_v59 = vmul.f32 %v2573_v28, %v3084_v49  ;;  %v2576_v23 = vadd.f32 %v758_v50, %v3079_v42  ;;  %v760_v24 = vpop.f32.mrb[15].mxu0 }
 0x221   :  { %v901_v30 = vmul.f32 %v2575_v47, %v3108_v0  ;;  %v929_v17 = vmul.f32 %v2575_v47, %v3087_v51  ;;  %v2578_v19 = vadd.f32 %v760_v24, %v3081_v43 }
 0x222   :  { %v2577_v31 = vadd.f32 %v2576_v23, %v3068_v32  ;;  %v1046_v37 = vadd.f32 %v928_v59, %v3111_v3  ;;  %v3179_v38 = vadd.f32 %v3114_v6, %v900_v58  ;;  %v889_v32 = vmul.f32 %v3094_v55, %v3108_v0 }
 0x223   :  { %v2579_v61 = vadd.f32 %v2578_v19, %v3070_v33  ;;  %v1047_v63 = vadd.f32 %v929_v17, %v3118_v9  ;;  %v3184_v42 = vadd.f32 %v3121_v10, %v901_v30 }
 0x224   :  { %v902_v2 = vmul.f32 %v2577_v31, %v3106_v62  ;;  %v930_v43 = vmul.f32 %v2577_v31, %v3084_v49 }
 0x225   :  { %v903_v3 = vmul.f32 %v2579_v61, %v3108_v0  ;;  %v931_v6 = vmul.f32 %v2579_v61, %v3087_v51 }
 0x226   :  { %v940_v33 = vadd.f32 %v930_v43, %v888_v1  ;;  %v3195_v9 = vadd.f32 %v3098_v57, %v902_v2 }
 0x227   :  { %v941_v10 = vadd.f32 %v931_v6, %v889_v32  ;;  %v3198_v7 = vadd.f32 %v3103_v60, %v903_v3  ;;  %v3233_v3 = vld [vmem:[%s3461_s1 + $0x8] sm:$0xff] }
 0x228   :  { %v1017_v52 = vadd.f32 %v3072_v34, %v940_v33 }
 0x229   :  { %v1018_v62 = vadd.f32 %v3074_v35, %v941_v10 }
 0x22a   :  { %2628 = vtanh.f32 %v1017_v52 }
 0x22b   :  { %2630 = vtanh.f32 %v1018_v62 }
 0x234   :  { %v2629_v49 = vpop.eup %2628 }
 0x235   :  { %v1021_v55 = vmul.f32 0.5, %v2629_v49  ;;  %v2631_v0 = vpop.eup %2630 }
 0x236   :  { %v1023_v60 = vmul.f32 0.5, %v2631_v0 }
 0x237   :  { %v1022_v8 = vadd.f32 0.5, %v1021_v55 }
 0x238   :  { %v1024_v34 = vadd.f32 0.5, %v1023_v60 }
 0x239   :  { %v1026_v11 = vmul.f32 %v2631_v0, %v1022_v8  ;;  %v1025_v51 = vmul.f32 0.0, %v1022_v8 }
 0x23b   :  { %1028 = vrot.lane.b32.xlu0 %v1026_v11, %s2851_s5 }
 0x2ad   :  { %v1029_v57 = vpop.permute.xlu0 %1028 }
 0x2ae   :  { %v1031_v26 = vadd.f32 %v1029_v57, %v1025_v51 }
 0x2b0   :  { %2632 = vtanh.f32 %v1031_v26  ;;  %1041 = vrot.lane.b32.xlu1 %v1031_v26, %s2851_s5 }
 0x2ba   :  { %v2633_v13 = vpop.eup %2632 }
 0x2bb   :  { %v1033_v35 = vmul.f32 %v2633_v13, %v1024_v34 }
 0x2bd   :  { %1035 = vrot.lane.b32.xlu0 %v1033_v35, %s2851_s5 }
 0x322   :  { %v1042_v39 = vpop.permute.xlu1 %1041 }
 0x323   :  { %v1044_v40 = vmul.f32 %v1042_v39, %v932_v36 }
 0x325   :  { %1131 = vrot.lane.b32.xlu1 %v1044_v40, %s2851_s5 }
 0x32f   :  { %v1036_v44 = vpop.permute.xlu0 %1035 }
 0x330   :  { %v3209_v27 = vmul.f32 %v1036_v44, %v932_v36 }
 0x332   :  { %1143 = vrot.lane.b32.xlu1 %v3209_v27, %s2851_s5  ;;  %2147 = vmatmul.mubr.msk.f32.vlgmr.msra.gmra.mrb[18].mxu1 %vm942_vm1, %v3209_v27 }
 0x333   :  { %2435 = vmatpush1.bf16.msra.mxu1 %v3008_v18  ;;  %1235 = vmatprep.mubr.f32.mxu1 %v2850_v48 }
 0x334   :  { %2437 = vmatprep.subr.bf16.mxu1 %v3013_v29 }
 0x337   :  { %2439 = vmatpush1.bf16.msra.mxu1 %v3018_v41 }
 0x338   :  { %2441 = vmatprep.subr.bf16.mxu1 %v3023_v54 }
 0x33b   :  { %2443 = vmatpush1.bf16.msra.mxu1 %v3028_v4 }
 0x33c   :  { %2445 = vmatprep.subr.bf16.mxu1 %v3031_v5 }
 0x33f   :  { %2447 = vmatpush1.bf16.msra.mxu1 %v3035_v16 }
 0x340   :  { %2449 = vmatprep.subr.bf16.mxu1 %v3005_v15 }
 0x397   :  { %v1132_v30 = vpop.permute.xlu1 %1131 }
 0x3a4   :  { %v1144_v43 = vpop.permute.xlu1 %1143 }
 0x405   :  { %v1117_v45 = vpop.f32.mrb[18].mxu1 }
 0x406   :  { %v1122_v21 = vadd.f32 %v1117_v45, %v1046_v37  ;;  %v1119_v28 = vpop.f32.mrb[19].mxu1 }
 0x407   :  { %v1123_v47 = vadd.f32 %v1119_v28, %v1047_v63 }
 0x408   :  { %2634 = vtanh.f32 %v1122_v21 }
 0x409   :  { %2636 = vtanh.f32 %v1123_v47  ;;  %v3261_v47 = vld [vmem:[%s3461_s1 + $0x10] sm:$0xff] }
 0x412   :  { %v2635_v50 = vpop.eup %2634 }
 0x413   :  { %v1126_v58 = vmul.f32 0.5, %v2635_v50  ;;  %v2637_v23 = vpop.eup %2636 }
 0x414   :  { %v1128_v37 = vmul.f32 0.5, %v2637_v23 }
 0x415   :  { %v1127_v59 = vadd.f32 0.5, %v1126_v58 }
 0x416   :  { %v1129_v1 = vadd.f32 0.5, %v1128_v37 }
 0x417   :  { %v1135_v24 = vmul.f32 %v2637_v23, %v1127_v59  ;;  %v1134_v17 = vmul.f32 %v1132_v30, %v1127_v59 }
 0x419   :  { %1137 = vrot.lane.b32.xlu0 %v1135_v24, %s2851_s5 }
 0x48b   :  { %v1138_v19 = vpop.permute.xlu0 %1137 }
 0x48c   :  { %v1140_v31 = vadd.f32 %v1138_v19, %v1134_v17 }
 0x48e   :  { %2638 = vtanh.f32 %v1140_v31  ;;  %v1153_v61 = vsub.f32 %v1140_v31, %v1132_v30 }
 0x490   :  { %1155 = vrot.lane.b32.xlu1 %v1153_v61, %s2851_s5 }
 0x498   :  { %v2639_v63 = vpop.eup %2638 }
 0x499   :  { %v3226_v2 = vmul.f32 %v2639_v63, %v1129_v1 }
 0x49b   :  { %v1146_v32 = vsub.f32 %v3226_v2, %v1144_v43 }
 0x49d   :  { %1148 = vrot.lane.b32.xlu0 %v1146_v32, %s2851_s5 }
 0x502   :  { %v1156_v6 = vpop.permute.xlu1 %1155 }
 0x503   :  { %v1158_v33 = vmul.f32 %v1156_v6, %v3233_v3 }
 0x505   :  { %v1159_v10 = vadd.f32 %v1158_v33, %v1044_v40 }
 0x507   :  { %1251 = vrot.lane.b32.xlu0 %v1159_v10, %s2851_s5 }
 0x50f   :  { %v1149_v52 = vpop.permute.xlu0 %1148 }
 0x510   :  { %v1151_v62 = vmul.f32 %v1149_v52, %v3233_v3 }
 0x512   :  { %v1152_v49 = vadd.f32 %v1151_v62, %v3209_v27 }
 0x514   :  { %1263 = vrot.lane.b32.xlu0 %v1152_v49, %s2851_s5  ;;  %2148 = vmatmul.mubr.msk.f32.vlgmr.msra.gmra.mrb[20].mxu1 %vm942_vm1, %v1152_v49 }
 0x515   :  { %2451 = vmatpush1.bf16.msra.mxu1 %v3008_v18  ;;  %1355 = vmatprep.mubr.f32.mxu1 %v2850_v48 }
 0x516   :  { %2453 = vmatprep.subr.bf16.mxu1 %v3013_v29 }
 0x519   :  { %2455 = vmatpush1.bf16.msra.mxu1 %v3018_v41 }
 0x51a   :  { %2457 = vmatprep.subr.bf16.mxu1 %v3023_v54 }
 0x51d   :  { %2459 = vmatpush1.bf16.msra.mxu1 %v3028_v4 }
 0x51e   :  { %2461 = vmatprep.subr.bf16.mxu1 %v3031_v5 }
 0x521   :  { %2463 = vmatpush1.bf16.msra.mxu1 %v3035_v16 }
 0x522   :  { %2465 = vmatprep.subr.bf16.mxu1 %v3005_v15 }
 0x579   :  { %v1252_v13 = vpop.permute.xlu0 %1251 }
 0x586   :  { %v1264_v21 = vpop.permute.xlu0 %1263 }
 0x5e7   :  { %v1237_v55 = vpop.f32.mrb[20].mxu1 }
 0x5e8   :  { %v1242_v8 = vadd.f32 %v1237_v55, %v3161_v22  ;;  %v1239_v0 = vpop.f32.mrb[21].mxu1 }
 0x5e9   :  { %v1243_v11 = vadd.f32 %v1239_v0, %v3166_v53 }
 0x5ea   :  { %2640 = vtanh.f32 %v1242_v8 }
 0x5eb   :  { %2642 = vtanh.f32 %v1243_v11  ;;  %v3288_v11 = vld [vmem:[%s3461_s1 + $0x18] sm:$0xff] }
 0x5f4   :  { %v2641_v51 = vpop.eup %2640 }
 0x5f5   :  { %v1246_v57 = vmul.f32 0.5, %v2641_v51  ;;  %v2643_v60 = vpop.eup %2642 }
 0x5f6   :  { %v1248_v22 = vmul.f32 0.5, %v2643_v60 }
 0x5f7   :  { %v1247_v26 = vadd.f32 0.5, %v1246_v57 }
 0x5f8   :  { %v1249_v44 = vadd.f32 0.5, %v1248_v22 }
 0x5f9   :  { %v1255_v34 = vmul.f32 %v2643_v60, %v1247_v26  ;;  %v1254_v35 = vmul.f32 %v1252_v13, %v1247_v26 }
 0x5fb   :  { %1257 = vrot.lane.b32.xlu1 %v1255_v34, %s2851_s5 }
 0x66d   :  { %v1258_v36 = vpop.permute.xlu1 %1257 }
 0x66e   :  { %v1260_v39 = vadd.f32 %v1258_v36, %v1254_v35 }
 0x670   :  { %2644 = vtanh.f32 %v1260_v39  ;;  %v1273_v40 = vsub.f32 %v1260_v39, %v1252_v13 }
 0x672   :  { %1275 = vrot.lane.b32.xlu0 %v1273_v40, %s2851_s5 }
 0x67a   :  { %v2645_v53 = vpop.eup %2644 }
 0x67b   :  { %v3254_v45 = vmul.f32 %v2645_v53, %v1249_v44 }
 0x67d   :  { %v1266_v28 = vsub.f32 %v3254_v45, %v1264_v21 }
 0x67f   :  { %1268 = vrot.lane.b32.xlu1 %v1266_v28, %s2851_s5 }
 0x6e4   :  { %v1276_v50 = vpop.permute.xlu0 %1275 }
 0x6e5   :  { %v1278_v58 = vmul.f32 %v1276_v50, %v3261_v47 }
 0x6e7   :  { %v1279_v59 = vadd.f32 %v1278_v58, %v1159_v10 }
 0x6e9   :  { %1371 = vrot.lane.b32.xlu1 %v1279_v59, %s2851_s5 }
 0x6f1   :  { %v1269_v23 = vpop.permute.xlu1 %1268 }
 0x6f2   :  { %v1271_v24 = vmul.f32 %v1269_v23, %v3261_v47 }
 0x6f4   :  { %v1272_v30 = vadd.f32 %v1271_v24, %v1152_v49 }
 0x6f6   :  { %2149 = vmatmul.mubr.msk.f32.vlgmr.msra.gmra.mrb[22].mxu1 %vm942_vm1, %v1272_v30  ;;  %1383 = vrot.lane.b32.xlu1 %v1272_v30, %s2851_s5 }
 0x6f7   :  { %2467 = vmatpush1.bf16.msra.mxu1 %v3008_v18  ;;  %1475 = vmatprep.mubr.f32.mxu1 %v2850_v48 }
 0x6f8   :  { %2469 = vmatprep.subr.bf16.mxu1 %v3013_v29 }
 0x6fb   :  { %2471 = vmatpush1.bf16.msra.mxu1 %v3018_v41 }
 0x6fc   :  { %2473 = vmatprep.subr.bf16.mxu1 %v3023_v54 }
 0x6ff   :  { %2475 = vmatpush1.bf16.msra.mxu1 %v3028_v4 }
 0x700   :  { %2477 = vmatprep.subr.bf16.mxu1 %v3031_v5 }
 0x703   :  { %2479 = vmatpush1.bf16.msra.mxu1 %v3035_v16 }
 0x704   :  { %2481 = vmatprep.subr.bf16.mxu1 %v3005_v15 }
 0x75b   :  { %v1372_v6 = vpop.permute.xlu1 %1371 }
 0x768   :  { %v1384_v8 = vpop.permute.xlu1 %1383 }
 0x7c9   :  { %v1357_v17 = vpop.f32.mrb[22].mxu1 }
 0x7ca   :  { %v1362_v19 = vadd.f32 %v1357_v17, %v3145_v12  ;;  %v1359_v31 = vpop.f32.mrb[23].mxu1 }
 0x7cb   :  { %v1363_v61 = vadd.f32 %v1359_v31, %v3150_v14 }
 0x7cc   :  { %2646 = vtanh.f32 %v1362_v19 }
 0x7cd   :  { %2648 = vtanh.f32 %v1363_v61  ;;  %v3315_v61 = vld [vmem:[%s3461_s1 + $0x20] sm:$0xff] }
 0x7d6   :  { %v2647_v37 = vpop.eup %2646 }
 0x7d7   :  { %v1366_v1 = vmul.f32 0.5, %v2647_v37  ;;  %v2649_v43 = vpop.eup %2648 }
 0x7d8   :  { %v1368_v12 = vmul.f32 0.5, %v2649_v43 }
 0x7d9   :  { %v1367_v63 = vadd.f32 0.5, %v1366_v1 }
 0x7da   :  { %v1369_v49 = vadd.f32 0.5, %v1368_v12 }
 0x7db   :  { %v1375_v32 = vmul.f32 %v2649_v43, %v1367_v63  ;;  %v1374_v33 = vmul.f32 %v1372_v6, %v1367_v63 }
 0x7dd   :  { %1377 = vrot.lane.b32.xlu0 %v1375_v32, %s2851_s5 }
 0x84f   :  { %v1378_v10 = vpop.permute.xlu0 %1377 }
 0x850   :  { %v1380_v52 = vadd.f32 %v1378_v10, %v1374_v33 }
 0x852   :  { %2650 = vtanh.f32 %v1380_v52  ;;  %v1393_v62 = vsub.f32 %v1380_v52, %v1372_v6 }
 0x854   :  { %1395 = vrot.lane.b32.xlu1 %v1393_v62, %s2851_s5 }
 0x85c   :  { %v2651_v14 = vpop.eup %2650 }
 0x85d   :  { %v3281_v55 = vmul.f32 %v2651_v14, %v1369_v49 }
 0x85f   :  { %v1386_v0 = vsub.f32 %v3281_v55, %v1384_v8 }
 0x861   :  { %1388 = vrot.lane.b32.xlu0 %v1386_v0, %s2851_s5 }
 0x8c6   :  { %v1396_v51 = vpop.permute.xlu1 %1395 }
 0x8c7   :  { %v1398_v57 = vmul.f32 %v1396_v51, %v3288_v11 }
 0x8c9   :  { %v1399_v26 = vadd.f32 %v1398_v57, %v1279_v59 }
 0x8cb   :  { %1491 = vrot.lane.b32.xlu0 %v1399_v26, %s2851_s5 }
 0x8d3   :  { %v1389_v60 = vpop.permute.xlu0 %1388 }
 0x8d4   :  { %v1391_v34 = vmul.f32 %v1389_v60, %v3288_v11 }
 0x8d6   :  { %v1392_v13 = vadd.f32 %v1391_v34, %v1272_v30 }
 0x8d8   :  { %1503 = vrot.lane.b32.xlu0 %v1392_v13, %s2851_s5  ;;  %2150 = vmatmul.mubr.msk.f32.vlgmr.msra.gmra.mrb[24].mxu1 %vm942_vm1, %v1392_v13 }
 0x8d9   :  { %2483 = vmatpush1.bf16.msra.mxu1 %v3008_v18  ;;  %1595 = vmatprep.mubr.f32.mxu1 %v2850_v48 }
 0x8da   :  { %2485 = vmatprep.subr.bf16.mxu1 %v3013_v29 }
 0x8dd   :  { %2487 = vmatpush1.bf16.msra.mxu1 %v3018_v41 }
 0x8de   :  { %2489 = vmatprep.subr.bf16.mxu1 %v3023_v54 }
 0x8e1   :  { %2491 = vmatpush1.bf16.msra.mxu1 %v3028_v4 }
 0x8e2   :  { %2493 = vmatprep.subr.bf16.mxu1 %v3031_v5 }
 0x8e5   :  { %2495 = vmatpush1.bf16.msra.mxu1 %v3035_v16 }
 0x8e6   :  { %2497 = vmatprep.subr.bf16.mxu1 %v3005_v15 }
 0x93d   :  { %v1492_v50 = vpop.permute.xlu0 %1491 }
 0x94a   :  { %v1504_v19 = vpop.permute.xlu0 %1503 }
 0x9ab   :  { %v1477_v35 = vpop.f32.mrb[24].mxu1 }
 0x9ac   :  { %v1482_v36 = vadd.f32 %v1477_v35, %v3147_v25  ;;  %v1479_v39 = vpop.f32.mrb[25].mxu1 }
 0x9ad   :  { %v1483_v40 = vadd.f32 %v1479_v39, %v3152_v20  ;;  %v3339_v39 = vld [vmem:[%s3461_s1 + $0x28] sm:$0xff] }
 0x9ae   :  { %2652 = vtanh.f32 %v1482_v36 }
 0x9af   :  { %2654 = vtanh.f32 %v1483_v40 }
 0x9b8   :  { %v2653_v22 = vpop.eup %2652 }
 0x9b9   :  { %v1486_v44 = vmul.f32 0.5, %v2653_v22  ;;  %v2655_v21 = vpop.eup %2654 }
 0x9ba   :  { %v1488_v25 = vmul.f32 0.5, %v2655_v21 }
 0x9bb   :  { %v1487_v53 = vadd.f32 0.5, %v1486_v44 }
 0x9bc   :  { %v1489_v30 = vadd.f32 0.5, %v1488_v25 }
 0x9bd   :  { %v1495_v28 = vmul.f32 %v2655_v21, %v1487_v53  ;;  %v1494_v58 = vmul.f32 %v1492_v50, %v1487_v53 }
 0x9bf   :  { %1497 = vrot.lane.b32.xlu1 %v1495_v28, %s2851_s5 }
 0xa31   :  { %v1498_v59 = vpop.permute.xlu1 %1497 }
 0xa32   :  { %v1500_v23 = vadd.f32 %v1498_v59, %v1494_v58 }
 0xa34   :  { %2656 = vtanh.f32 %v1500_v23  ;;  %v1513_v24 = vsub.f32 %v1500_v23, %v1492_v50 }
 0xa36   :  { %1515 = vrot.lane.b32.xlu0 %v1513_v24, %s2851_s5 }
 0xa3e   :  { %v2657_v20 = vpop.eup %2656 }
 0xa3f   :  { %v3308_v17 = vmul.f32 %v2657_v20, %v1489_v30 }
 0xa41   :  { %v1506_v31 = vsub.f32 %v3308_v17, %v1504_v19 }
 0xa43   :  { %1508 = vrot.lane.b32.xlu1 %v1506_v31, %s2851_s5 }
 0xaa8   :  { %v1516_v37 = vpop.permute.xlu0 %1515 }
 0xaa9   :  { %v1518_v1 = vmul.f32 %v1516_v37, %v3315_v61 }
 0xaab   :  { %v1519_v63 = vadd.f32 %v1518_v1, %v1399_v26  ;;  %v3362_v1 = vld [vmem:[%s3461_s1 + $0x30] sm:$0xff] }
 0xaad   :  { %1611 = vrot.lane.b32.xlu1 %v1519_v63, %s2851_s5 }
 0xab5   :  { %v1509_v43 = vpop.permute.xlu1 %1508 }
 0xab6   :  { %v1511_v32 = vmul.f32 %v1509_v43, %v3315_v61 }
 0xab8   :  { %v1512_v6 = vadd.f32 %v1511_v32, %v1392_v13 }
 0xaba   :  { %2151 = vmatmul.mubr.msk.f32.vlgmr.msra.gmra.mrb[26].mxu1 %vm942_vm1, %v1512_v6  ;;  %1623 = vrot.lane.b32.xlu1 %v1512_v6, %s2851_s5 }
 0xabb   :  { %2499 = vmatpush1.bf16.msra.mxu1 %v3008_v18  ;;  %1715 = vmatprep.mubr.f32.mxu1 %v2850_v48 }
 0xabc   :  { %2501 = vmatprep.subr.bf16.mxu1 %v3013_v29 }
 0xabf   :  { %2503 = vmatpush1.bf16.msra.mxu1 %v3018_v41 }
 0xac0   :  { %2505 = vmatprep.subr.bf16.mxu1 %v3023_v54 }
 0xac3   :  { %2507 = vmatpush1.bf16.msra.mxu1 %v3028_v4 }
 0xac4   :  { %2509 = vmatprep.subr.bf16.mxu1 %v3031_v5 }
 0xac7   :  { %2511 = vmatpush1.bf16.msra.mxu1 %v3035_v16 }
 0xac8   :  { %2513 = vmatprep.subr.bf16.mxu1 %v3005_v15 }
 0xb1f   :  { %v1612_v51 = vpop.permute.xlu1 %1611 }
 0xb2c   :  { %v1624_v35 = vpop.permute.xlu1 %1623 }
 0xb8d   :  { %v1597_v33 = vpop.f32.mrb[26].mxu1 }
 0xb8e   :  { %v1602_v10 = vadd.f32 %v1597_v33, %v3163_v46  ;;  %v1599_v52 = vpop.f32.mrb[27].mxu1 }
 0xb8f   :  { %v1603_v62 = vadd.f32 %v1599_v52, %v3168_v56 }
 0xb90   :  { %2658 = vtanh.f32 %v1602_v10 }
 0xb91   :  { %2660 = vtanh.f32 %v1603_v62 }
 0xb9a   :  { %v2659_v12 = vpop.eup %2658 }
 0xb9b   :  { %v1606_v49 = vmul.f32 0.5, %v2659_v12  ;;  %v2661_v8 = vpop.eup %2660 }
 0xb9c   :  { %v1608_v46 = vmul.f32 0.5, %v2661_v8 }
 0xb9d   :  { %v1607_v14 = vadd.f32 0.5, %v1606_v49 }
 0xb9e   :  { %v1609_v34 = vadd.f32 0.5, %v1608_v46  ;;  %v1877_v46 = vld [vmem:[#allocation10] sm:$0xff] }
 0xb9f   :  { %v1615_v0 = vmul.f32 %v2661_v8, %v1607_v14  ;;  %v1614_v57 = vmul.f32 %v1612_v51, %v1607_v14 }
 0xba1   :  { %1617 = vrot.lane.b32.xlu0 %v1615_v0, %s2851_s5 }
 0xc13   :  { %v1618_v26 = vpop.permute.xlu0 %1617 }
 0xc14   :  { %v1620_v60 = vadd.f32 %v1618_v26, %v1614_v57  ;;  %v2852_v57 = vmov 0.0|0.0  }
 0xc16   :  { %2662 = vtanh.f32 %v1620_v60  ;;  %v1633_v15 = vsub.f32 %v1620_v60, %v1612_v51  ;;  %v1878_v51 = vld [vmem:[%s3469_s9] sm:$0xff] }
 0xc17   :  { %v1869_v60 = vld [vmem:[%s3470_s10] sm:$0xff] }
 0xc18   :  { %1635 = vrot.lane.b32.xlu1 %v1633_v15, %s2851_s5  ;;  %v1870_v15 = vld [vmem:[%s3470_s10 + $0x8] sm:$0xff] }
 0xc20   :  { %v2663_v56 = vpop.eup %2662 }
 0xc21   :  { %v1622_v13 = vmul.f32 %v2663_v56, %v1609_v34  ;;  %v2533_v34 = vpack.c.bf16 %v1870_v15, %v1869_v60  ;;  %v1871_v56 = vld [vmem:[%s3470_s10 + $0x10] sm:$0xff] }
 0xc23   :  { %v1626_v36 = vsub.f32 %v1622_v13, %v1624_v35  ;;  %v1873_v35 = vld [vmem:[%s3470_s10 + $0x20] sm:$0xff] }
 0xc25   :  { %1628 = vrot.lane.b32.xlu0 %v1626_v36, %s2851_s5  ;;  %v1874_v36 = vld [vmem:[%s3470_s10 + $0x28] sm:$0xff] }
 0xc8a   :  { %v1636_v40 = vpop.permute.xlu1 %1635 }
 0xc8b   :  { %v1638_v22 = vmul.f32 %v1636_v40, %v3339_v39 }
 0xc8d   :  { %v1639_v44 = vadd.f32 %v1638_v22, %v1519_v63 }
 0xc8f   :  { %1731 = vrot.lane.b32.xlu0 %v1639_v44, %s2851_s5 }
 0xc97   :  { %v1629_v53 = vpop.permute.xlu0 %1628 }
 0xc98   :  { %v1631_v21 = vmul.f32 %v1629_v53, %v3339_v39 }
 0xc9a   :  { %v1632_v28 = vadd.f32 %v1631_v21, %v1512_v6  ;;  %v1875_v21 = vld [vmem:[%s3470_s10 + $0x30] sm:$0xff] }
 0xc9c   :  { %1743 = vrot.lane.b32.xlu0 %v1632_v28, %s2851_s5  ;;  %2152 = vmatmul.mubr.msk.f32.vlgmr.msra.gmra.mrb[28].mxu1 %vm942_vm1, %v1632_v28 }
 0xc9d   :  { %2515 = vmatpush1.bf16.msra.mxu1 %v3008_v18  ;;  %1835 = vmatprep.mubr.f32.mxu1 %v2850_v48 }
 0xc9e   :  { %2517 = vmatprep.subr.bf16.mxu1 %v3013_v29 }
 0xca1   :  { %2519 = vmatpush1.bf16.msra.mxu1 %v3018_v41 }
 0xca2   :  { %2521 = vmatprep.subr.bf16.mxu1 %v3023_v54 }
 0xca5   :  { %2523 = vmatpush1.bf16.msra.mxu1 %v3028_v4 }
 0xca6   :  { %2525 = vmatprep.subr.bf16.mxu1 %v3031_v5 }
 0xca9   :  { %2527 = vmatpush1.bf16.msra.mxu1 %v3035_v16 }
 0xcaa   :  { %2528 = vmatprep.subr.bf16.mxu1 %v2852_v57 }
 0xd01   :  { %v1732_v54 = vpop.permute.xlu0 %1731 }
 0xd0e   :  { %v1744_v31 = vpop.permute.xlu0 %1743 }
 0xd6f   :  { %v1717_v50 = vpop.f32.mrb[28].mxu1 }
 0xd70   :  { %v1722_v58 = vadd.f32 %v1717_v50, %v3179_v38  ;;  %v1719_v59 = vpop.f32.mrb[29].mxu1 }
 0xd71   :  { %v1723_v18 = vadd.f32 %v1719_v59, %v3184_v42 }
 0xd72   :  { %2664 = vtanh.f32 %v1722_v58 }
 0xd73   :  { %2666 = vtanh.f32 %v1723_v18 }
 0xd7c   :  { %v2665_v23 = vpop.eup %2664 }
 0xd7d   :  { %v1726_v29 = vmul.f32 0.5, %v2665_v23  ;;  %v2667_v41 = vpop.eup %2666 }
 0xd7e   :  { %v1728_v38 = vmul.f32 0.5, %v2667_v41 }
 0xd7f   :  { %v1727_v24 = vadd.f32 0.5, %v1726_v29 }
 0xd80   :  { %v1729_v20 = vadd.f32 0.5, %v1728_v38 }
 0xd81   :  { %v1735_v25 = vmul.f32 %v2667_v41, %v1727_v24  ;;  %v1734_v4 = vmul.f32 %v1732_v54, %v1727_v24 }
 0xd83   :  { %1737 = vrot.lane.b32.xlu1 %v1735_v25, %s2851_s5 }
 0xdf5   :  { %v1738_v5 = vpop.permute.xlu1 %1737 }
 0xdf6   :  { %v1740_v30 = vadd.f32 %v1738_v5, %v1734_v4 }
 0xdf8   :  { %2668 = vtanh.f32 %v1740_v30  ;;  %v1753_v16 = vsub.f32 %v1740_v30, %v1732_v54 }
 0xdfa   :  { %1755 = vrot.lane.b32.xlu0 %v1753_v16, %s2851_s5 }
 0xe02   :  { %v2669_v42 = vpop.eup %2668 }
 0xe03   :  { %v1742_v19 = vmul.f32 %v2669_v42, %v1729_v20 }
 0xe05   :  { %v1746_v37 = vsub.f32 %v1742_v19, %v1744_v31 }
 0xe07   :  { %1748 = vrot.lane.b32.xlu1 %v1746_v37, %s2851_s5 }
 0xe6c   :  { %v1756_v63 = vpop.permute.xlu0 %1755 }
 0xe6d   :  { %v1758_v43 = vmul.f32 %v1756_v63, %v3362_v1 }
 0xe6f   :  { %v1759_v32 = vadd.f32 %v1758_v43, %v1639_v44 }
 0xe71   :  { %1851 = vrot.lane.b32.xlu1 %v1759_v32, %s2851_s5 }
 0xe75   :  { %1161 = vrot.lane.b32.xlu1 %v3226_v2, %s2851_s5 }
 0xe79   :  { %v1749_v6 = vpop.permute.xlu1 %1748  ;;  %1401 = vrot.lane.b32.xlu1 %v3281_v55, %s2851_s5 }
 0xe7a   :  { %v1751_v33 = vmul.f32 %v1749_v6, %v3362_v1 }
 0xe7c   :  { %v1752_v10 = vadd.f32 %v1751_v33, %v1632_v28  ;;  %v1876_v28 = vld [vmem:[%s3470_s10 + $0x38] sm:$0xff] }
 0xe7d   :  { %1641 = vrot.lane.b32.xlu1 %v1622_v13, %s2851_s5  ;;  %v2542_v50 = vpack.c.bf16 %v1876_v28, %v1875_v21 }
 0xe7e   :  { %2153 = vmatmul.mubr.msk.f32.vlgmr.msra.gmra.mrb[30].mxu1 %vm942_vm1, %v1752_v10 }
 0xe7f   :  { %2179 = vmatprep.mubr.msk.f32.mxu1 %vm2854_vm5, %v2850_v48 }
 0xee3   :  { %v1852_v40 = vpop.permute.xlu1 %1851 }
 0xee7   :  { %v1162_v24 = vpop.permute.xlu1 %1161 }
 0xee8   :  { %v1164_v54 = vmul.f32 %v1162_v24, %v3233_v3 }
 0xeea   :  { %v1165_v5 = vadd.f32 %v1164_v54, %v3209_v27  ;;  %v939_v27 = vld [vmem:[%s3461_s1 + $0x38] sm:$0xff] }
 0xeeb   :  { %v1402_v30 = vpop.permute.xlu1 %1401 }
 0xeec   :  { %v1404_v20 = vmul.f32 %v1402_v30, %v3288_v11  ;;  %v2033_v11 = vld [vmem:[%s3471_s11 + $0x8] sm:$0x3] }
 0xeef   :  { %v1642_v31 = vpop.permute.xlu1 %1641 }
 0xef0   :  { %v1644_v43 = vmul.f32 %v1642_v31, %v3339_v39 }
 0xf51   :  { %v1837_v52 = vpop.f32.mrb[30].mxu1 }
 0xf52   :  { %v1842_v62 = vadd.f32 %v1837_v52, %v3195_v9  ;;  %v1839_v12 = vpop.f32.mrb[31].mxu1  ;;  %v1879_v9 = vld [vmem:[%s3469_s9 + $0x8] sm:$0x3] }
 0xf53   :  { %v1843_v49 = vadd.f32 %v1839_v12, %v3198_v7  ;;  %v2529_v7 = vpack.c.bf16 %v1879_v9, %v1878_v51 }
 0xf54   :  { %2670 = vtanh.f32 %v1842_v62 }
 0xf55   :  { %2672 = vtanh.f32 %v1843_v49  ;;  %2531 = vmatpush3.bf16.msk.msra.mxu1 %vm3382_vm4, %v2529_v7 }
 0xf56   :  { %2532 = vmatprep.subr.bf16.mxu1 %v2852_v57 }
 0xf58   :  { %2180 = vmatmul.mubr.msk.f32.vlgmr.msra.gmra.mrb[32].mxu1 %vm1880_vm6, %v1877_v46 }
 0xf59   :  { %2534 = vmatpush3.bf16.msra.mxu1 %v2533_v34  ;;  %2198 = vmatprep.mubr.msk.f32.mxu1 %vm2854_vm5, %v2850_v48 }
 0xf5a   :  { %2535 = vmatprep.subr.bf16.mxu1 %v2852_v57 }
 0xf5e   :  { %v2671_v2 = vpop.eup %2670 }
 0xf5f   :  { %v1846_v14 = vmul.f32 0.5, %v2671_v2  ;;  %v2673_v0 = vpop.eup %2672  ;;  %v2159_v2 = vld [vmem:[%s3472_s12] ss:$0 sm:$0xff] }
 0xf60   :  { %v1848_v58 = vmul.f32 0.5, %v2673_v0 }
 0xf61   :  { %v1847_v8 = vadd.f32 0.5, %v1846_v14 }
 0xf62   :  { %v1849_v59 = vadd.f32 0.5, %v1848_v58 }
 0xf63   :  { %v1855_v55 = vmul.f32 %v2673_v0, %v1847_v8  ;;  %v1854_v22 = vmul.f32 %v1852_v40, %v1847_v8 }
 0xf65   :  { %1857 = vrot.lane.b32.xlu0 %v1855_v55, %s2851_s5 }
 0xf69   :  { %1281 = vrot.lane.b32.xlu0 %v3254_v45, %s2851_s5  ;;  %v1872_v45 = vld [vmem:[%s3470_s10 + $0x18] sm:$0xff] }
 0xf6a   :  { %v2536_v13 = vpack.c.bf16 %v1872_v45, %v1871_v56 }
 0xf6c   :  { %2537 = vmatpush3.bf16.msra.mxu1 %v2536_v13 }
 0xf6d   :  { %1521 = vrot.lane.b32.xlu0 %v3308_v17, %s2851_s5  ;;  %v2539_v17 = vpack.c.bf16 %v1874_v36, %v1873_v35  ;;  %2538 = vmatprep.subr.bf16.mxu1 %v2852_v57 }
 0xf70   :  { %2540 = vmatpush3.bf16.msra.mxu1 %v2539_v17 }
 0xf71   :  { %1761 = vrot.lane.b32.xlu0 %v1742_v19, %s2851_s5  ;;  %2541 = vmatprep.subr.bf16.mxu1 %v2852_v57 }
 0xf74   :  { %2543 = vmatpush3.bf16.msra.mxu1 %v2542_v50 }
 0xf75   :  { %2544 = vmatprep.subr.bf16.mxu1 %v2852_v57 }
 0xfd7   :  { %v1858_v44 = vpop.permute.xlu0 %1857 }
 0xfd8   :  { %v1860_v53 = vadd.f32 %v1858_v44, %v1854_v22 }
 0xfda   :  { %2674 = vtanh.f32 %v1860_v53 }
 0xfdb   :  { %v1282_v25 = vpop.permute.xlu0 %1281 }
 0xfdc   :  { %v1284_v4 = vmul.f32 %v1282_v25, %v3261_v47  ;;  %v2032_v47 = vld [vmem:[%s3471_s11] sm:$0xff] }
 0xfdd   :  { %v2545_v10 = vpack.c.bf16 %v2033_v11, %v2032_v47 }
 0xfde   :  { %v1285_v16 = vadd.f32 %v1284_v4, %v1165_v5 }
 0xfdf   :  { %v1522_v38 = vpop.permute.xlu0 %1521 }
 0xfe0   :  { %v1405_v42 = vadd.f32 %v1404_v20, %v1285_v16  ;;  %v1524_v19 = vmul.f32 %v1522_v38, %v3315_v61 }
 0xfe2   :  { %v1525_v37 = vadd.f32 %v1524_v19, %v1405_v42 }
 0xfe3   :  { %v1762_v63 = vpop.permute.xlu0 %1761 }
 0xfe4   :  { %v2675_v18 = vpop.eup %2674  ;;  %v1645_v32 = vadd.f32 %v1644_v43, %v1525_v37  ;;  %v1764_v3 = vmul.f32 %v1762_v63, %v3362_v1  ;;  %v2031_v1 = vld [vmem:[#allocation11] sm:$0xff] }
 0xfe5   :  { %v1862_v23 = vmul.f32 %v2675_v18, %v1849_v59 }
 0xfe6   :  { %v1765_v6 = vadd.f32 %v1764_v3, %v1645_v32 }
 0xfe7   :  { %1864 = vrot.lane.b32.xlu1 %v1862_v23, %s2851_s5 }
0x102b   :  { %v1954_v29 = vpop.f32.mrb[32].mxu1 }
0x102c   :  { %v2181_v41 = vpop.f32.mrb[33].mxu1 }
0x1059   :  { %v1865_v61 = vpop.permute.xlu1 %1864 }
0x105a   :  { %v1867_v33 = vmul.f32 %v1865_v61, %v939_v27 }
0x105c   :  { %v1868_v39 = vadd.f32 %v1867_v33, %v1765_v6 }
0x105e   :  { %2199 = vmatmul.mubr.msk.f32.vlgmr.msra.gmra.mrb[34].mxu1 %vm942_vm1, %v1868_v39 }
0x105f   :  { %2547 = vmatpush3.bf16.msk.msra.mxu1 %vm3382_vm4, %v2545_v10  ;;  %2205 = vmatprep.mubr.msk.f32.mxu1 %vm2854_vm5, %v2850_v48 }
0x1062   :  { %2206 = vmatmul.mubr.msk.f32.vlgmr.msra.gmra.mrb[36].mxu1 %vm1880_vm6, %v2031_v1 }
0x1131   :  { %v2027_v52 = vpop.f32.mrb[34].mxu1 }
0x1132   :  { %v2028_v62 = vadd.f32 %v2027_v52, %v1954_v29  ;;  %v2200_v12 = vpop.f32.mrb[35].mxu1 }
0x1135   :  { %v2106_v49 = vpop.f32.mrb[36].mxu1 }
0x1136   :  { %v2110_v14 = vadd.f32 %v2106_v49, %v2028_v62  ;;  %v2207_v8 = vpop.f32.mrb[37].mxu1 }
0x1138   :  { %v2118_v0 = vadd.f32 %v2159_v2, %v2110_v14 }
0x113a   :  { %2120 = vst.msk [vmem:[#allocation13] sm:$0xff] %vm2119_vm7, %v2118_v0 }
0x113b   :  { %2819 = shalt.err (!%p2816_p10)
}
0x113c   :  { %s2820_s7 = scalar_lea.hbm %s3473_s13, 128 }
0x113d   :  { %p2821_p11 = scmp.ne.s32.totalorder %s3473_s13, %s2820_s7  ;;  %p2824_p12 = scmp.lt.u32.totalorder %s2820_s7, %s3473_s13 }
0x113f   :  { %p2826_p13 = pnand %p2824_p12, %p2821_p11 }
0x1141   :  { %2829 = shalt.err (!%p2826_p13)
}
0x1142   :  { %2130 = dma.vmem_to_hbm [thread:$0]  %s2128_s29, 128, %s3473_s13, [#allocation4]  }
0x1143   :  { %2838 = dma.done.wait [#allocation4], 128  }
0x1144   :  { %2839 = vsyncadd [#allocation4], 4294967168 }
0x1145   :  { %2134 = vsyncpa [#allocation3], 1 }
0x1146   :  { %2135 = vsyncpa [#allocation6], 1 }
0x1147   :  { %2136 = vsyncpa [#allocation9], 1 }
0x1148   :  { %2137 = vsyncpa [#allocation12], 1 }
0x1149   :  { %2138 = vsyncpa [#allocation4], 1 }

</bundles_post_ra>
